<compile_context>
chip_gen: v7x
topology: tpu7x:2x2x1
jax: 0.10.0
libtpu: 0.0.40
codegen_flags: <defaults>
</compile_context>

<pallas_src>
import math
from functools import partial

import jax
import jax.numpy as jnp
from jax import lax
from jax.experimental import pallas as pl
from jax.experimental.pallas import tpu as pltpu


# --------------------------- shared math helpers ----------------------------

def _layernorm(x, g, b, eps=1e-5):
    mu = jnp.mean(x, axis=-1, keepdims=True)
    var = jnp.mean((x - mu) ** 2, axis=-1, keepdims=True)
    return (x - mu) * lax.rsqrt(var + eps) * g + b


def _gelu_tanh(x):
    # GELU(approximate='tanh'), matches PyTorch
    c = math.sqrt(2.0 / math.pi)
    return 0.5 * x * (1.0 + jnp.tanh(c * (x + 0.044715 * x * x * x)))


def _vmem_limit(nbytes_resident):
    """Scoped-VMEM limit: resident bytes x4 (intermediates / double-buffering)
    plus 2 MiB headroom, clamped to a range safe on v5e/v6e/v7x."""
    return int(min(max(4 * nbytes_resident + (2 << 20), 16 << 20), 56 << 20))


def _nbytes(a):
    return int(a.size) * jnp.dtype(a.dtype).itemsize


# -------------------------- fused transformer block --------------------------

def _block_kernel(x_ref,
                  ln1_g_ref, ln1_b_ref,
                  attn_w_ref, attn_b_ref,
                  attn_pw_ref, attn_pb_ref,
                  ln2_g_ref, ln2_b_ref,
                  fc_w_ref, fc_b_ref,
                  mlp_pw_ref, mlp_pb_ref,
                  o_ref, *, n_head):
    B, T, C = x_ref.shape
    H = n_head
    D = C // H
    scale = 1.0 / math.sqrt(D)

    # Fold batch*time rows; keep all element-wise math in f32.
    x = x_ref[...].astype(jnp.float32).reshape(B * T, C)

    # ---- attention: LN1 -> QKV -> causal attn (head-batched) -> proj -> +res
    h = _layernorm(x, ln1_g_ref[...], ln1_b_ref[...])
    qkv = jnp.dot(h.astype(jnp.bfloat16), attn_w_ref[...],
                  preferred_element_type=jnp.float32) + attn_b_ref[...]
    q = qkv[:, 0:C] * scale          # pre-scale q once (cheaper than scaling s)
    k = qkv[:, C:2 * C]
    v = qkv[:, 2 * C:3 * C]

    # Head split without in-kernel transposes: lane-slice each head, reshape
    # the (folded) row axis back to (B,T), stack heads on the leading axis.
    def to_heads(a):                                    # [B*T, C] -> [H*B, T, D]
        return jnp.concatenate(
            [a[:, hd * D:(hd + 1) * D].reshape(B, T, D) for hd in range(H)],
            axis=0)

    qh = to_heads(q).astype(jnp.bfloat16)
    kh = to_heads(k).astype(jnp.bfloat16)
    vh = to_heads(v).astype(jnp.bfloat16)

    # One batched MXU contraction for all heads (leading batch dim n = h*B+b).
    s = jnp.einsum('nqd,nkd->nqk', qh, kh,
                   preferred_element_type=jnp.float32)          # [H*B, T, T]
    row = lax.broadcasted_iota(jnp.int32, (T, T), 0)
    col = lax.broadcasted_iota(jnp.int32, (T, T), 1)
    causal = (col <= row)[None, :, :]
    s = jnp.where(causal, s, -1e30)                     # f32: -1e30 is safe
    s = s - jnp.max(s, axis=-1, keepdims=True)
    p = jnp.exp(s)
    l = jnp.sum(p, axis=-1, keepdims=True)              # [H*B, T, 1]
    o = jnp.einsum('nqk,nkd->nqd', p.astype(jnp.bfloat16), vh,
                   preferred_element_type=jnp.float32)          # [H*B, T, D]
    # Deferred softmax normalization: scale the [.,T,D] output, not [.,T,T] p.
    o = o * pl.reciprocal(l, approx=True)

    # Head merge (inverse of to_heads): slice leading axis, concat along lanes.
    y = jnp.concatenate(
        [o[hd * B:(hd + 1) * B].reshape(B * T, D) for hd in range(H)],
        axis=-1)                                        # [B*T, C]

    y = jnp.dot(y.astype(jnp.bfloat16), attn_pw_ref[...],
                preferred_element_type=jnp.float32) + attn_pb_ref[...]
    x = x + y                                           # residual (fused)

    # ---- MLP: LN2 -> fc + tanh-GELU -> proj -> +res
    h2 = _layernorm(x, ln2_g_ref[...], ln2_b_ref[...])
    h2 = jnp.dot(h2.astype(jnp.bfloat16), fc_w_ref[...],
                 preferred_element_type=jnp.float32) + fc_b_ref[...]
    h2 = _gelu_tanh(h2)
    h2 = jnp.dot(h2.astype(jnp.bfloat16), mlp_pw_ref[...],
                 preferred_element_type=jnp.float32) + mlp_pb_ref[...]
    x = x + h2                                          # residual (fused)

    o_ref[...] = x.reshape(B, T, C).astype(o_ref.dtype)


def block_forward(p, x, n_head):
    B, T, C = x.shape
    bf16 = jnp.bfloat16
    args = [
        x,
        p["ln1_g"].reshape(1, C), p["ln1_b"].reshape(1, C),
        p["attn_w"].astype(bf16), p["attn_b"].reshape(1, 3 * C),
        p["attn_proj_w"].astype(bf16), p["attn_proj_b"].reshape(1, C),
        p["ln2_g"].reshape(1, C), p["ln2_b"].reshape(1, C),
        p["fc_w"].astype(bf16), p["fc_b"].reshape(1, 4 * C),
        p["mlp_proj_w"].astype(bf16), p["mlp_proj_b"].reshape(1, C),
    ]
    resident = sum(_nbytes(a) for a in args) + B * T * C * 4
    return pl.pallas_call(
        partial(_block_kernel, n_head=n_head),
        out_shape=jax.ShapeDtypeStruct((B, T, C), x.dtype),
        input_output_aliases={0: 0},      # residual stream reuses x's buffer
        compiler_params=pltpu.CompilerParams(
            vmem_limit_bytes=_vmem_limit(resident)),
    )(*args)


# --------------------- fused final-LN + tied lm_head -------------------------

def _final_kernel(x_ref, g_ref, b_ref, wte_ref, o_ref):
    B, T, C = x_ref.shape
    x = x_ref[...].astype(jnp.float32).reshape(B * T, C)
    h = _layernorm(x, g_ref[...], b_ref[...]).astype(jnp.bfloat16)
    # logits_tile = h @ wte_tile.T (weight tying) without materializing wte.T:
    # contract dim 1 of h against dim 1 of the [TV, C] wte tile.
    logits = lax.dot_general(h, wte_ref[...],
                             dimension_numbers=(((1,), (1,)), ((), ())),
                             preferred_element_type=jnp.float32)
    o_ref[...] = logits.reshape(B, T, -1).astype(o_ref.dtype)


def final_ln_lm_head(x, g, b, wte):
    B, T, C = x.shape
    V = wte.shape[0]
    # Vocab tile: lane-dense (multiple of 128) when possible, else whole vocab.
    if V % 512 == 0:
        TV = 512
    elif V % 256 == 0:
        TV = 256
    elif V % 128 == 0:
        TV = 128
    else:
        TV = V
    wte_bf = wte.astype(jnp.bfloat16)
    resident = (B * T * C * 4 + 2 * C * 4
                + 2 * TV * C * 2      # double-buffered bf16 wte tile
                + 2 * B * T * TV * 4)  # double-buffered output tile
    return pl.pallas_call(
        _final_kernel,
        out_shape=jax.ShapeDtypeStruct((B, T, V), x.dtype),
        grid=(V // TV,),
        in_specs=[
            pl.BlockSpec((B, T, C), lambda j: (0, 0, 0)),
            pl.BlockSpec((1, C), lambda j: (0, 0)),
            pl.BlockSpec((1, C), lambda j: (0, 0)),
            pl.BlockSpec((TV, C), lambda j: (j, 0)),
        ],
        out_specs=pl.BlockSpec((B, T, TV), lambda j: (0, 0, j)),
        compiler_params=pltpu.CompilerParams(
            dimension_semantics=("parallel",),
            vmem_limit_bytes=_vmem_limit(resident)),
    )(x, g.reshape(1, C), b.reshape(1, C), wte_bf)


# ------------------------------ model glue -----------------------------------

class GPTConfig:
    block_size = 16
    vocab_size = 64
    n_layer = 2
    n_head = 4
    n_embd = 32


def init_params(key, cfg):
    std = 0.02

    def normal(key, shape):
        return jax.random.normal(key, shape, dtype=jnp.float32) * std

    keys = iter(jax.random.split(key, 4 + cfg.n_layer * 8))
    C = cfg.n_embd
    params = {
        "wte": normal(next(keys), (cfg.vocab_size, C)),    # tied with lm_head
        "wpe": normal(next(keys), (cfg.block_size, C)),
        "ln_f_g": jnp.ones((C,), jnp.float32),
        "ln_f_b": jnp.zeros((C,), jnp.float32),
        "blocks": [],
    }
    for _ in range(cfg.n_layer):
        blk = {
            "ln1_g": jnp.ones((C,), jnp.float32),
            "ln1_b": jnp.zeros((C,), jnp.float32),
            "attn_w": normal(next(keys), (C, 3 * C)),      # stored [in, out]
            "attn_b": jnp.zeros((3 * C,), jnp.float32),
            "attn_proj_w": normal(next(keys), (C, C)),
            "attn_proj_b": jnp.zeros((C,), jnp.float32),
            "ln2_g": jnp.ones((C,), jnp.float32),
            "ln2_b": jnp.zeros((C,), jnp.float32),
            "fc_w": normal(next(keys), (C, 4 * C)),
            "fc_b": jnp.zeros((4 * C,), jnp.float32),
            "mlp_proj_w": normal(next(keys), (4 * C, C)),
            "mlp_proj_b": jnp.zeros((C,), jnp.float32),
        }
        params["blocks"].append(blk)
    return params


def gpt_forward(params, idx, cfg):
    B, T = idx.shape
    # token / position embedding gather: plain-JAX glue (tiny, data-dependent)
    tok_emb = params["wte"][idx]           # [B, T, C]
    pos_emb = params["wpe"][:T]            # [T, C]
    x = tok_emb + pos_emb[None, :, :]
    for blk in params["blocks"]:
        x = block_forward(blk, x, cfg.n_head)
    logits = final_ln_lm_head(x, params["ln_f_g"], params["ln_f_b"],
                              params["wte"])
    return logits                          # [B, T, vocab]
    # TODO(synk): cross-entropy loss branch (targets) omitted; forward returns logits only.


# --------------------------- pure-JAX reference -------------------------------

def _ref_block(p, x, n_head):
    B, T, C = x.shape
    H, D = n_head, C // n_head
    h = _layernorm(x, p["ln1_g"], p["ln1_b"])
    qkv = h @ p["attn_w"] + p["attn_b"]
    q, k, v = jnp.split(qkv, 3, axis=-1)
    q = q.reshape(B, T, H, D).transpose(0, 2, 1, 3)
    k = k.reshape(B, T, H, D).transpose(0, 2, 1, 3)
    v = v.reshape(B, T, H, D).transpose(0, 2, 1, 3)
    s = jnp.einsum('bhqd,bhkd->bhqk', q, k) / math.sqrt(D)
    mask = jnp.tril(jnp.ones((T, T), bool))
    s = jnp.where(mask, s, -jnp.inf)
    att = jax.nn.softmax(s, axis=-1)
    y = jnp.einsum('bhqk,bhkd->bhqd', att, v)
    y = y.transpose(0, 2, 1, 3).reshape(B, T, C)
    y = y @ p["attn_proj_w"] + p["attn_proj_b"]
    x = x + y
    h2 = _layernorm(x, p["ln2_g"], p["ln2_b"])
    h2 = _gelu_tanh(h2 @ p["fc_w"] + p["fc_b"])
    return x + h2 @ p["mlp_proj_w"] + p["mlp_proj_b"]


def gpt_forward_ref(params, idx, cfg):
    tok = params["wte"][idx]
    pos = params["wpe"][:idx.shape[1]]
    x = tok + pos[None, :, :]
    for blk in params["blocks"]:
        x = _ref_block(blk, x, cfg.n_head)
    x = _layernorm(x, params["ln_f_g"], params["ln_f_b"])
    return x @ params["wte"].T


# --------------------------------- main --------------------------------------

if __name__ == "__main__":
    cfg = GPTConfig()
    key = jax.random.PRNGKey(0)
    pkey, ikey = jax.random.split(key)
    params = init_params(pkey, cfg)

    B, T = 2, 8
    idx = jax.random.randint(ikey, (B, T), 0, cfg.vocab_size, dtype=jnp.int32)

    fwd = jax.jit(partial(gpt_forward, cfg=cfg))
    logits = fwd(params, idx)
    jax.block_until_ready(logits)
    assert logits.shape == (B, T, cfg.vocab_size)
    assert bool(jnp.all(jnp.isfinite(logits)))

    # Loose check vs. an f32 pure-JAX reference (bf16 MXU operands + approx
    # reciprocal in the kernel make exact matching impossible by design).
    ref = gpt_forward_ref(params, idx, cfg)
    err = float(jnp.max(jnp.abs(logits.astype(jnp.float32) - ref)))
    assert err < 5e-2, f"max |logits - ref| = {err}"
    print("KERNEL_OK")
</pallas_src>

<mosaic_0001>
module attributes {stable_mosaic.version = 11 : i64} {
  func.func @_final_kernel(%arg0: i32, %arg1: memref<2x8x32xf32, #tpu.memory_space<vmem>>, %arg2: memref<1x32xf32, #tpu.memory_space<vmem>>, %arg3: memref<1x32xf32, #tpu.memory_space<vmem>>, %arg4: memref<64x32xbf16, #tpu.memory_space<vmem>>, %arg5: memref<2x8x64xf32, #tpu.memory_space<vmem>>) attributes {dimension_semantics = [#tpu.dimension_semantics<parallel>], iteration_bounds = array<i64: 1>, scalar_prefetch = 0 : i64, scratch_operands = 0 : i64, tpu.core_type = #tpu.core_type<tc>, window_params = [{pipeline_mode = #tpu.pipeline_mode<synchronous>, transform_indices = @transform_0, window_bounds = array<i64: 2, 8, 32>}, {pipeline_mode = #tpu.pipeline_mode<synchronous>, transform_indices = @transform_1, window_bounds = array<i64: 1, 32>}, {pipeline_mode = #tpu.pipeline_mode<synchronous>, transform_indices = @transform_2, window_bounds = array<i64: 1, 32>}, {transform_indices = @transform_3, window_bounds = array<i64: 64, 32>}, {transform_indices = @transform_4, window_bounds = array<i64: 2, 8, 64>}]} {
    %c0 = arith.constant 0 : index
    %c0_0 = arith.constant 0 : index
    %c0_1 = arith.constant 0 : index
    %0 = vector.load %arg1[%c0, %c0_0, %c0_1] : memref<2x8x32xf32, #tpu.memory_space<vmem>>, vector<2x8x32xf32>
    %1 = vector.shape_cast %0 : vector<2x8x32xf32> to vector<16x32xf32>
    %c0_2 = arith.constant 0 : index
    %c0_3 = arith.constant 0 : index
    %2 = vector.load %arg2[%c0_2, %c0_3] : memref<1x32xf32, #tpu.memory_space<vmem>>, vector<1x32xf32>
    %c0_4 = arith.constant 0 : index
    %c0_5 = arith.constant 0 : index
    %3 = vector.load %arg3[%c0_4, %c0_5] : memref<1x32xf32, #tpu.memory_space<vmem>>, vector<1x32xf32>
    %cst = arith.constant dense<0.000000e+00> : vector<16xf32>
    %4 = vector.multi_reduction <add>, %1, %cst [1] : vector<16x32xf32> to vector<16xf32>
    %5 = vector.shape_cast %4 : vector<16xf32> to vector<16x1xf32>
    %cst_6 = arith.constant 3.200000e+01 : f32
    %6 = vector.broadcast %cst_6 : f32 to vector<16x1xf32>
    %7 = arith.divf %5, %6 : vector<16x1xf32>
    %8 = vector.broadcast %7 : vector<16x1xf32> to vector<16x32xf32>
    %9 = arith.subf %1, %8 : vector<16x32xf32>
    %10 = arith.mulf %9, %9 : vector<16x32xf32>
    %cst_7 = arith.constant dense<0.000000e+00> : vector<16xf32>
    %11 = vector.multi_reduction <add>, %10, %cst_7 [1] : vector<16x32xf32> to vector<16xf32>
    %12 = vector.shape_cast %11 : vector<16xf32> to vector<16x1xf32>
    %cst_8 = arith.constant 3.200000e+01 : f32
    %13 = vector.broadcast %cst_8 : f32 to vector<16x1xf32>
    %14 = arith.divf %12, %13 : vector<16x1xf32>
    %15 = vector.broadcast %7 : vector<16x1xf32> to vector<16x32xf32>
    %16 = arith.subf %1, %15 : vector<16x32xf32>
    %cst_9 = arith.constant 9.99999974E-6 : f32
    %17 = vector.broadcast %cst_9 : f32 to vector<16x1xf32>
    %18 = arith.addf %14, %17 : vector<16x1xf32>
    %19 = math.rsqrt %18 : vector<16x1xf32>
    %20 = vector.broadcast %19 : vector<16x1xf32> to vector<16x32xf32>
    %21 = arith.mulf %16, %20 : vector<16x32xf32>
    %22 = vector.broadcast %2 : vector<1x32xf32> to vector<16x32xf32>
    %23 = arith.mulf %21, %22 : vector<16x32xf32>
    %24 = vector.broadcast %3 : vector<1x32xf32> to vector<16x32xf32>
    %25 = arith.addf %23, %24 : vector<16x32xf32>
    %26 = arith.truncf %25 : vector<16x32xf32> to vector<16x32xbf16>
    %c0_10 = arith.constant 0 : index
    %c0_11 = arith.constant 0 : index
    %27 = vector.load %arg4[%c0_10, %c0_11] : memref<64x32xbf16, #tpu.memory_space<vmem>>, vector<64x32xbf16>
    %cst_12 = arith.constant dense<0.000000e+00> : vector<16x64xf32>
    %28 = tpu.matmul %26, %27, %cst_12 {dimension_numbers = #tpu.dot_dimension_numbers<[1], [1], [0], [0], [0, 0, 1, 0], [], []>} : vector<16x32xbf16>, vector<64x32xbf16>, vector<16x64xf32> -> vector<16x64xf32>
    %29 = vector.shape_cast %28 : vector<16x64xf32> to vector<2x8x64xf32>
    %c0_13 = arith.constant 0 : index
    %c0_14 = arith.constant 0 : index
    %c0_15 = arith.constant 0 : index
    %30 = vector.load %arg5[%c0_13, %c0_14, %c0_15] : memref<2x8x64xf32, #tpu.memory_space<vmem>>, vector<2x8x64xf32>
    tpu.vector_store %arg5[%c0_13, %c0_14, %c0_15], %29 {strides = array<i32>} : memref<2x8x64xf32, #tpu.memory_space<vmem>>, vector<2x8x64xf32>,
    return
  }
  func.func @transform_0(%arg0: i32) -> (i32, i32, i32) {
    %c0_i32 = arith.constant 0 : i32
    %c0_i32_0 = arith.constant 0 : i32
    %c0_i32_1 = arith.constant 0 : i32
    %c0_i32_2 = arith.constant 0 : i32
    return %c0_i32, %c0_i32_0, %c0_i32_1 : i32, i32, i32
  }
  func.func @transform_1(%arg0: i32) -> (i32, i32) {
    %c0_i32 = arith.constant 0 : i32
    %c0_i32_0 = arith.constant 0 : i32
    %c0_i32_1 = arith.constant 0 : i32
    return %c0_i32, %c0_i32_0 : i32, i32
  }
  func.func @transform_2(%arg0: i32) -> (i32, i32) {
    %c0_i32 = arith.constant 0 : i32
    %c0_i32_0 = arith.constant 0 : i32
    %c0_i32_1 = arith.constant 0 : i32
    return %c0_i32, %c0_i32_0 : i32, i32
  }
  func.func @transform_3(%arg0: i32) -> (i32, i32) {
    %c0_i32 = arith.constant 0 : i32
    %c0_i32_0 = arith.constant 0 : i32
    return %arg0, %c0_i32 : i32, i32
  }
  func.func @transform_4(%arg0: i32) -> (i32, i32, i32) {
    %c0_i32 = arith.constant 0 : i32
    %c0_i32_0 = arith.constant 0 : i32
    %c0_i32_1 = arith.constant 0 : i32
    return %c0_i32, %c0_i32_0, %arg0 : i32, i32, i32
  }
}

module attributes {stable_mosaic.version = 11 : i64} {
  func.func @_block_kernel(%arg0: memref<2x8x32xf32, #tpu.memory_space<vmem>>, %arg1: memref<1x32xf32, #tpu.memory_space<vmem>>, %arg2: memref<1x32xf32, #tpu.memory_space<vmem>>, %arg3: memref<32x96xbf16, #tpu.memory_space<vmem>>, %arg4: memref<1x96xf32, #tpu.memory_space<vmem>>, %arg5: memref<32x32xbf16, #tpu.memory_space<vmem>>, %arg6: memref<1x32xf32, #tpu.memory_space<vmem>>, %arg7: memref<1x32xf32, #tpu.memory_space<vmem>>, %arg8: memref<1x32xf32, #tpu.memory_space<vmem>>, %arg9: memref<32x128xbf16, #tpu.memory_space<vmem>>, %arg10: memref<1x128xf32, #tpu.memory_space<vmem>>, %arg11: memref<128x32xbf16, #tpu.memory_space<vmem>>, %arg12: memref<1x32xf32, #tpu.memory_space<vmem>>, %arg13: memref<2x8x32xf32, #tpu.memory_space<vmem>>) attributes {dimension_semantics = [], scalar_prefetch = 0 : i64, scratch_operands = 0 : i64, tpu.core_type = #tpu.core_type<tc>} {
    %c0 = arith.constant 0 : index
    %c0_0 = arith.constant 0 : index
    %c0_1 = arith.constant 0 : index
    %0 = vector.load %arg0[%c0, %c0_0, %c0_1] : memref<2x8x32xf32, #tpu.memory_space<vmem>>, vector<2x8x32xf32>
    %1 = vector.shape_cast %0 : vector<2x8x32xf32> to vector<16x32xf32>
    %c0_2 = arith.constant 0 : index
    %c0_3 = arith.constant 0 : index
    %2 = vector.load %arg1[%c0_2, %c0_3] : memref<1x32xf32, #tpu.memory_space<vmem>>, vector<1x32xf32>
    %c0_4 = arith.constant 0 : index
    %c0_5 = arith.constant 0 : index
    %3 = vector.load %arg2[%c0_4, %c0_5] : memref<1x32xf32, #tpu.memory_space<vmem>>, vector<1x32xf32>
    %cst = arith.constant dense<0.000000e+00> : vector<16xf32>
    %4 = vector.multi_reduction <add>, %1, %cst [1] : vector<16x32xf32> to vector<16xf32>
    %5 = vector.shape_cast %4 : vector<16xf32> to vector<16x1xf32>
    %cst_6 = arith.constant 3.200000e+01 : f32
    %6 = vector.broadcast %cst_6 : f32 to vector<16x1xf32>
    %7 = arith.divf %5, %6 : vector<16x1xf32>
    %8 = vector.broadcast %7 : vector<16x1xf32> to vector<16x32xf32>
    %9 = arith.subf %1, %8 : vector<16x32xf32>
    %10 = arith.mulf %9, %9 : vector<16x32xf32>
    %cst_7 = arith.constant dense<0.000000e+00> : vector<16xf32>
    %11 = vector.multi_reduction <add>, %10, %cst_7 [1] : vector<16x32xf32> to vector<16xf32>
    %12 = vector.shape_cast %11 : vector<16xf32> to vector<16x1xf32>
    %cst_8 = arith.constant 3.200000e+01 : f32
    %13 = vector.broadcast %cst_8 : f32 to vector<16x1xf32>
    %14 = arith.divf %12, %13 : vector<16x1xf32>
    %15 = vector.broadcast %7 : vector<16x1xf32> to vector<16x32xf32>
    %16 = arith.subf %1, %15 : vector<16x32xf32>
    %cst_9 = arith.constant 9.99999974E-6 : f32
    %17 = vector.broadcast %cst_9 : f32 to vector<16x1xf32>
    %18 = arith.addf %14, %17 : vector<16x1xf32>
    %19 = math.rsqrt %18 : vector<16x1xf32>
    %20 = vector.broadcast %19 : vector<16x1xf32> to vector<16x32xf32>
    %21 = arith.mulf %16, %20 : vector<16x32xf32>
    %22 = vector.broadcast %2 : vector<1x32xf32> to vector<16x32xf32>
    %23 = arith.mulf %21, %22 : vector<16x32xf32>
    %24 = vector.broadcast %3 : vector<1x32xf32> to vector<16x32xf32>
    %25 = arith.addf %23, %24 : vector<16x32xf32>
    %26 = arith.truncf %25 : vector<16x32xf32> to vector<16x32xbf16>
    %c0_10 = arith.constant 0 : index
    %c0_11 = arith.constant 0 : index
    %27 = vector.load %arg3[%c0_10, %c0_11] : memref<32x96xbf16, #tpu.memory_space<vmem>>, vector<32x96xbf16>
    %cst_12 = arith.constant dense<0.000000e+00> : vector<16x96xf32>
    %28 = tpu.matmul %26, %27, %cst_12 {dimension_numbers = #tpu.dot_dimension_numbers<[1], [0], [0], [1], [0, 0, 1, 1], [], []>} : vector<16x32xbf16>, vector<32x96xbf16>, vector<16x96xf32> -> vector<16x96xf32>
    %c0_13 = arith.constant 0 : index
    %c0_14 = arith.constant 0 : index
    %29 = vector.load %arg4[%c0_13, %c0_14] : memref<1x96xf32, #tpu.memory_space<vmem>>, vector<1x96xf32>
    %30 = vector.broadcast %29 : vector<1x96xf32> to vector<16x96xf32>
    %31 = arith.addf %28, %30 : vector<16x96xf32>
    %32 = vector.extract_strided_slice %31 {offsets = [0, 0], sizes = [16, 32], strides = [1, 1]} : vector<16x96xf32> to vector<16x32xf32>
    %cst_15 = arith.constant 0.353553385 : f32
    %33 = vector.broadcast %cst_15 : f32 to vector<16x32xf32>
    %34 = arith.mulf %32, %33 : vector<16x32xf32>
    %35 = vector.extract_strided_slice %31 {offsets = [0, 32], sizes = [16, 32], strides = [1, 1]} : vector<16x96xf32> to vector<16x32xf32>
    %36 = vector.extract_strided_slice %31 {offsets = [0, 64], sizes = [16, 32], strides = [1, 1]} : vector<16x96xf32> to vector<16x32xf32>
    %37 = vector.extract_strided_slice %34 {offsets = [0, 0], sizes = [16, 8], strides = [1, 1]} : vector<16x32xf32> to vector<16x8xf32>
    %38 = vector.shape_cast %37 : vector<16x8xf32> to vector<2x8x8xf32>
    %39 = vector.extract_strided_slice %34 {offsets = [0, 8], sizes = [16, 8], strides = [1, 1]} : vector<16x32xf32> to vector<16x8xf32>
    %40 = vector.shape_cast %39 : vector<16x8xf32> to vector<2x8x8xf32>
    %41 = vector.extract_strided_slice %34 {offsets = [0, 16], sizes = [16, 8], strides = [1, 1]} : vector<16x32xf32> to vector<16x8xf32>
    %42 = vector.shape_cast %41 : vector<16x8xf32> to vector<2x8x8xf32>
    %43 = vector.extract_strided_slice %34 {offsets = [0, 24], sizes = [16, 8], strides = [1, 1]} : vector<16x32xf32> to vector<16x8xf32>
    %44 = vector.shape_cast %43 : vector<16x8xf32> to vector<2x8x8xf32>
    %45 = tpu.concatenate %38, %40, %42, %44 in 0 : vector<2x8x8xf32>, vector<2x8x8xf32>, vector<2x8x8xf32>, vector<2x8x8xf32> -> vector<8x8x8xf32>
    %46 = arith.truncf %45 : vector<8x8x8xf32> to vector<8x8x8xbf16>
    %47 = vector.extract_strided_slice %35 {offsets = [0, 0], sizes = [16, 8], strides = [1, 1]} : vector<16x32xf32> to vector<16x8xf32>
    %48 = vector.shape_cast %47 : vector<16x8xf32> to vector<2x8x8xf32>
    %49 = vector.extract_strided_slice %35 {offsets = [0, 8], sizes = [16, 8], strides = [1, 1]} : vector<16x32xf32> to vector<16x8xf32>
    %50 = vector.shape_cast %49 : vector<16x8xf32> to vector<2x8x8xf32>
    %51 = vector.extract_strided_slice %35 {offsets = [0, 16], sizes = [16, 8], strides = [1, 1]} : vector<16x32xf32> to vector<16x8xf32>
    %52 = vector.shape_cast %51 : vector<16x8xf32> to vector<2x8x8xf32>
    %53 = vector.extract_strided_slice %35 {offsets = [0, 24], sizes = [16, 8], strides = [1, 1]} : vector<16x32xf32> to vector<16x8xf32>
    %54 = vector.shape_cast %53 : vector<16x8xf32> to vector<2x8x8xf32>
    %55 = tpu.concatenate %48, %50, %52, %54 in 0 : vector<2x8x8xf32>, vector<2x8x8xf32>, vector<2x8x8xf32>, vector<2x8x8xf32> -> vector<8x8x8xf32>
    %56 = arith.truncf %55 : vector<8x8x8xf32> to vector<8x8x8xbf16>
    %57 = vector.extract_strided_slice %36 {offsets = [0, 0], sizes = [16, 8], strides = [1, 1]} : vector<16x32xf32> to vector<16x8xf32>
    %58 = vector.shape_cast %57 : vector<16x8xf32> to vector<2x8x8xf32>
    %59 = vector.extract_strided_slice %36 {offsets = [0, 8], sizes = [16, 8], strides = [1, 1]} : vector<16x32xf32> to vector<16x8xf32>
    %60 = vector.shape_cast %59 : vector<16x8xf32> to vector<2x8x8xf32>
    %61 = vector.extract_strided_slice %36 {offsets = [0, 16], sizes = [16, 8], strides = [1, 1]} : vector<16x32xf32> to vector<16x8xf32>
    %62 = vector.shape_cast %61 : vector<16x8xf32> to vector<2x8x8xf32>
    %63 = vector.extract_strided_slice %36 {offsets = [0, 24], sizes = [16, 8], strides = [1, 1]} : vector<16x32xf32> to vector<16x8xf32>
    %64 = vector.shape_cast %63 : vector<16x8xf32> to vector<2x8x8xf32>
    %65 = tpu.concatenate %58, %60, %62, %64 in 0 : vector<2x8x8xf32>, vector<2x8x8xf32>, vector<2x8x8xf32>, vector<2x8x8xf32> -> vector<8x8x8xf32>
    %66 = arith.truncf %65 : vector<8x8x8xf32> to vector<8x8x8xbf16>
    "tpu.trace_start"() <{level = 10 : i32, message = "nqd,nkd->nqk"}> : () -> ()
    %cst_16 = arith.constant dense<0.000000e+00> : vector<8x8x8xf32>
    %67 = tpu.matmul %46, %56, %cst_16 {dimension_numbers = #tpu.dot_dimension_numbers<[2], [2], [1], [1], [0, 0, 0, 1, 1, 1], [0], [0]>} : vector<8x8x8xbf16>, vector<8x8x8xbf16>, vector<8x8x8xf32> -> vector<8x8x8xf32>
    "tpu.trace_stop"() : () -> ()
    %68 = tpu.iota {dimensions = array<i32: 0>} : vector<8x8xi32>
    %69 = tpu.iota {dimensions = array<i32: 1>} : vector<8x8xi32>
    %70 = arith.cmpi sle, %69, %68 : vector<8x8xi32>
    %71 = vector.shape_cast %70 : vector<8x8xi1> to vector<1x8x8xi1>
    %cst_17 = arith.constant -1.000000e+30 : f32
    %72 = vector.shape_cast %71 : vector<1x8x8xi1> to vector<1x8x8xi1>
    %73 = vector.broadcast %72 : vector<1x8x8xi1> to vector<8x8x8xi1>
    %74 = vector.broadcast %cst_17 : f32 to vector<8x8x8xf32>
    %75 = arith.select %73, %67, %74 : vector<8x8x8xi1>, vector<8x8x8xf32>
    %cst_18 = arith.constant dense<0xFF800000> : vector<8x8xf32>
    %76 = vector.multi_reduction <maximumf>, %75, %cst_18 [2] : vector<8x8x8xf32> to vector<8x8xf32>
    %77 = vector.shape_cast %76 : vector<8x8xf32> to vector<8x8x1xf32>
    %78 = vector.broadcast %77 : vector<8x8x1xf32> to vector<8x8x8xf32>
    %79 = arith.subf %75, %78 : vector<8x8x8xf32>
    %80 = math.exp %79 : vector<8x8x8xf32>
    %cst_19 = arith.constant dense<0.000000e+00> : vector<8x8xf32>
    %81 = vector.multi_reduction <add>, %80, %cst_19 [2] : vector<8x8x8xf32> to vector<8x8xf32>
    %82 = vector.shape_cast %81 : vector<8x8xf32> to vector<8x8x1xf32>
    %83 = arith.truncf %80 : vector<8x8x8xf32> to vector<8x8x8xbf16>
    "tpu.trace_start"() <{level = 10 : i32, message = "nqk,nkd->nqd"}> : () -> ()
    %cst_20 = arith.constant dense<0.000000e+00> : vector<8x8x8xf32>
    %84 = tpu.matmul %83, %66, %cst_20 {dimension_numbers = #tpu.dot_dimension_numbers<[2], [1], [1], [2], [0, 0, 0, 1, 1, 2], [0], [0]>} : vector<8x8x8xbf16>, vector<8x8x8xbf16>, vector<8x8x8xf32> -> vector<8x8x8xf32>
    "tpu.trace_stop"() : () -> ()
    %85 = tpu.reciprocal %82 {approx = true} : vector<8x8x1xf32> -> vector<8x8x1xf32>
    %86 = vector.broadcast %85 : vector<8x8x1xf32> to vector<8x8x8xf32>
    %87 = arith.mulf %84, %86 : vector<8x8x8xf32>
    %88 = vector.extract_strided_slice %87 {offsets = [0, 0, 0], sizes = [2, 8, 8], strides = [1, 1, 1]} : vector<8x8x8xf32> to vector<2x8x8xf32>
    %89 = vector.shape_cast %88 : vector<2x8x8xf32> to vector<16x8xf32>
    %90 = vector.extract_strided_slice %87 {offsets = [2, 0, 0], sizes = [2, 8, 8], strides = [1, 1, 1]} : vector<8x8x8xf32> to vector<2x8x8xf32>
    %91 = vector.shape_cast %90 : vector<2x8x8xf32> to vector<16x8xf32>
    %92 = vector.extract_strided_slice %87 {offsets = [4, 0, 0], sizes = [2, 8, 8], strides = [1, 1, 1]} : vector<8x8x8xf32> to vector<2x8x8xf32>
    %93 = vector.shape_cast %92 : vector<2x8x8xf32> to vector<16x8xf32>
    %94 = vector.extract_strided_slice %87 {offsets = [6, 0, 0], sizes = [2, 8, 8], strides = [1, 1, 1]} : vector<8x8x8xf32> to vector<2x8x8xf32>
    %95 = vector.shape_cast %94 : vector<2x8x8xf32> to vector<16x8xf32>
    %96 = tpu.concatenate %89, %91, %93, %95 in 1 : vector<16x8xf32>, vector<16x8xf32>, vector<16x8xf32>, vector<16x8xf32> -> vector<16x32xf32>
    %97 = arith.truncf %96 : vector<16x32xf32> to vector<16x32xbf16>
    %c0_21 = arith.constant 0 : index
    %c0_22 = arith.constant 0 : index
    %98 = vector.load %arg5[%c0_21, %c0_22] : memref<32x32xbf16, #tpu.memory_space<vmem>>, vector<32x32xbf16>
    %cst_23 = arith.constant dense<0.000000e+00> : vector<16x32xf32>
    %99 = tpu.matmul %97, %98, %cst_23 {dimension_numbers = #tpu.dot_dimension_numbers<[1], [0], [0], [1], [0, 0, 1, 1], [], []>} : vector<16x32xbf16>, vector<32x32xbf16>, vector<16x32xf32> -> vector<16x32xf32>
    %c0_24 = arith.constant 0 : index
    %c0_25 = arith.constant 0 : index
    %100 = vector.load %arg6[%c0_24, %c0_25] : memref<1x32xf32, #tpu.memory_space<vmem>>, vector<1x32xf32>
    %101 = vector.broadcast %100 : vector<1x32xf32> to vector<16x32xf32>
    %102 = arith.addf %99, %101 : vector<16x32xf32>
    %103 = arith.addf %1, %102 : vector<16x32xf32>
    %c0_26 = arith.constant 0 : index
    %c0_27 = arith.constant 0 : index
    %104 = vector.load %arg7[%c0_26, %c0_27] : memref<1x32xf32, #tpu.memory_space<vmem>>, vector<1x32xf32>
    %c0_28 = arith.constant 0 : index
    %c0_29 = arith.constant 0 : index
    %105 = vector.load %arg8[%c0_28, %c0_29] : memref<1x32xf32, #tpu.memory_space<vmem>>, vector<1x32xf32>
    %cst_30 = arith.constant dense<0.000000e+00> : vector<16xf32>
    %106 = vector.multi_reduction <add>, %103, %cst_30 [1] : vector<16x32xf32> to vector<16xf32>
    %107 = vector.shape_cast %106 : vector<16xf32> to vector<16x1xf32>
    %cst_31 = arith.constant 3.200000e+01 : f32
    %108 = vector.broadcast %cst_31 : f32 to vector<16x1xf32>
    %109 = arith.divf %107, %108 : vector<16x1xf32>
    %110 = vector.broadcast %109 : vector<16x1xf32> to vector<16x32xf32>
    %111 = arith.subf %103, %110 : vector<16x32xf32>
    %112 = arith.mulf %111, %111 : vector<16x32xf32>
    %cst_32 = arith.constant dense<0.000000e+00> : vector<16xf32>
    %113 = vector.multi_reduction <add>, %112, %cst_32 [1] : vector<16x32xf32> to vector<16xf32>
    %114 = vector.shape_cast %113 : vector<16xf32> to vector<16x1xf32>
    %cst_33 = arith.constant 3.200000e+01 : f32
    %115 = vector.broadcast %cst_33 : f32 to vector<16x1xf32>
    %116 = arith.divf %114, %115 : vector<16x1xf32>
    %117 = vector.broadcast %109 : vector<16x1xf32> to vector<16x32xf32>
    %118 = arith.subf %103, %117 : vector<16x32xf32>
    %cst_34 = arith.constant 9.99999974E-6 : f32
    %119 = vector.broadcast %cst_34 : f32 to vector<16x1xf32>
    %120 = arith.addf %116, %119 : vector<16x1xf32>
    %121 = math.rsqrt %120 : vector<16x1xf32>
    %122 = vector.broadcast %121 : vector<16x1xf32> to vector<16x32xf32>
    %123 = arith.mulf %118, %122 : vector<16x32xf32>
    %124 = vector.broadcast %104 : vector<1x32xf32> to vector<16x32xf32>
    %125 = arith.mulf %123, %124 : vector<16x32xf32>
    %126 = vector.broadcast %105 : vector<1x32xf32> to vector<16x32xf32>
    %127 = arith.addf %125, %126 : vector<16x32xf32>
    %128 = arith.truncf %127 : vector<16x32xf32> to vector<16x32xbf16>
    %c0_35 = arith.constant 0 : index
    %c0_36 = arith.constant 0 : index
    %129 = vector.load %arg9[%c0_35, %c0_36] : memref<32x128xbf16, #tpu.memory_space<vmem>>, vector<32x128xbf16>
    %cst_37 = arith.constant dense<0.000000e+00> : vector<16x128xf32>
    %130 = tpu.matmul %128, %129, %cst_37 {dimension_numbers = #tpu.dot_dimension_numbers<[1], [0], [0], [1], [0, 0, 1, 1], [], []>} : vector<16x32xbf16>, vector<32x128xbf16>, vector<16x128xf32> -> vector<16x128xf32>
    %c0_38 = arith.constant 0 : index
    %c0_39 = arith.constant 0 : index
    %131 = vector.load %arg10[%c0_38, %c0_39] : memref<1x128xf32, #tpu.memory_space<vmem>>, vector<1x128xf32>
    %132 = vector.broadcast %131 : vector<1x128xf32> to vector<16x128xf32>
    %133 = arith.addf %130, %132 : vector<16x128xf32>
    %cst_40 = arith.constant 5.000000e-01 : f32
    %134 = vector.broadcast %cst_40 : f32 to vector<16x128xf32>
    %135 = arith.mulf %134, %133 : vector<16x128xf32>
    %cst_41 = arith.constant 4.471500e-02 : f32
    %136 = vector.broadcast %cst_41 : f32 to vector<16x128xf32>
    %137 = arith.mulf %136, %133 : vector<16x128xf32>
    %138 = arith.mulf %137, %133 : vector<16x128xf32>
    %139 = arith.mulf %138, %133 : vector<16x128xf32>
    %140 = arith.addf %133, %139 : vector<16x128xf32>
    %cst_42 = arith.constant 0.797884583 : f32
    %141 = vector.broadcast %cst_42 : f32 to vector<16x128xf32>
    %142 = arith.mulf %141, %140 : vector<16x128xf32>
    %143 = math.tanh %142 : vector<16x128xf32>
    %cst_43 = arith.constant 1.000000e+00 : f32
    %144 = vector.broadcast %cst_43 : f32 to vector<16x128xf32>
    %145 = arith.addf %144, %143 : vector<16x128xf32>
    %146 = arith.mulf %135, %145 : vector<16x128xf32>
    %147 = arith.truncf %146 : vector<16x128xf32> to vector<16x128xbf16>
    %c0_44 = arith.constant 0 : index
    %c0_45 = arith.constant 0 : index
    %148 = vector.load %arg11[%c0_44, %c0_45] : memref<128x32xbf16, #tpu.memory_space<vmem>>, vector<128x32xbf16>
    %cst_46 = arith.constant dense<0.000000e+00> : vector<16x32xf32>
    %149 = tpu.matmul %147, %148, %cst_46 {dimension_numbers = #tpu.dot_dimension_numbers<[1], [0], [0], [1], [0, 0, 1, 1], [], []>} : vector<16x128xbf16>, vector<128x32xbf16>, vector<16x32xf32> -> vector<16x32xf32>
    %c0_47 = arith.constant 0 : index
    %c0_48 = arith.constant 0 : index
    %150 = vector.load %arg12[%c0_47, %c0_48] : memref<1x32xf32, #tpu.memory_space<vmem>>, vector<1x32xf32>
    %151 = vector.broadcast %150 : vector<1x32xf32> to vector<16x32xf32>
    %152 = arith.addf %149, %151 : vector<16x32xf32>
    %153 = arith.addf %103, %152 : vector<16x32xf32>
    %154 = vector.shape_cast %153 : vector<16x32xf32> to vector<2x8x32xf32>
    %c0_49 = arith.constant 0 : index
    %c0_50 = arith.constant 0 : index
    %c0_51 = arith.constant 0 : index
    %155 = vector.load %arg13[%c0_49, %c0_50, %c0_51] : memref<2x8x32xf32, #tpu.memory_space<vmem>>, vector<2x8x32xf32>
    tpu.vector_store %arg13[%c0_49, %c0_50, %c0_51], %154 {strides = array<i32>} : memref<2x8x32xf32, #tpu.memory_space<vmem>>, vector<2x8x32xf32>,
    return
  }
}

</mosaic_0001>

<bundles_post_ra>
// kernel: gpt_forward.5
= control target key start
LH: loop header
LB: loop body
LE: loop exit
PB: predicated region body
PF: predicated region fallthrough
CT: control target
= control target key end

     0   :  { %vm23_vm0 = vcmask 261120   ;;  %s307_s0 = inlined_call_operand.vmem [shape: f32[2,8,32], index: 0, kind: input, shape index: {}]   ;;  %s308_s1 = inlined_call_operand.vmem [shape: f32[1,32], index: 1, kind: input, shape index: {}]   ;;  %s309_s2 = inlined_call_operand.vmem [shape: f32[1,32], index: 2, kind: input, shape index: {}]   ;;  %s310_s3 = inlined_call_operand.vmem [shape: bf16[64,32], index: 3, kind: input, shape index: {}]   ;;  %s311_s4 = inlined_call_operand.hbm [shape: f32[2,8,64], index: 4, kind: output, shape index: {}]  }
   0x1   :  { %v19_v0 = vld [vmem:[%s307_s0] sm:$0xff]  ;;  %v20_v1 = vld [vmem:[%s307_s0 + $0x8] sm:$0xff] }
   0x2   :  { %v24_v2 = vsel %vm23_vm0, %v19_v0, 0.0  ;;  %v27_v3 = vsel %vm23_vm0, %v20_v1, 0.0 }
   0x3   :  { %25 = vadd.xlane.f32.xlu0 %v24_v2 }
   0x4   :  { %9 = vsyncpa [#allocation3], 0  ;;  %v200_v4 = vld [vmem:[%s310_s3] sm:$0xff]   ;;  %v232_v5 = vmov 0.0   ;;  %v201_v17 = vld [vmem:[%s310_s3 + $0x8] sm:$0xff]   ;;  %vm233_vm1 = vmmov 0  }
   0x5   :  { %183 = vmatprep.subr.bf16.mxu0 %v232_v5  ;;  %v100_v6 = vsel %vm23_vm0, %v200_v4, 0  ;;  %v103_v18 = vsel %vm23_vm0, %v201_v17, 0  ;;  %v202_v19 = vld [vmem:[%s310_s3 + $0x10] sm:$0xff]   ;;  %v203_v21 = vld [vmem:[%s310_s3 + $0x18] sm:$0xff]   ;;  %191 = vmatprep.mubr.msk.bf16.mxu0 %vm233_vm1, %v232_v5  ;;  %v171_v31 = vld [vmem:[%s308_s1] ss:$0 sm:$0xff] }
   0x6   :  { %184 = vmatpush3.bf16.xpose.msra.mxu0 %v100_v6  ;;  %v106_v20 = vsel %vm23_vm0, %v202_v19, 0  ;;  %v109_v22 = vsel %vm23_vm0, %v203_v21, 0  ;;  %v172_v35 = vld [vmem:[%s309_s2] ss:$0 sm:$0xff]  ;;  %s234_s29 = smov [#allocation2]   ;;  %vm152_vm2 = vcmask 523264  }
   0x7   :  { %28 = vadd.xlane.f32.xlu0 %v27_v3  ;;  %185 = vmatprep.subr.bf16.mxu0 %v232_v5  ;;  %s160_s30 = sshll.u32 %s234_s29, 4  ;;  %s161_s30 = int_to_ptr.vmem [resolvable:$true] %s160_s30 }
   0x8   :  { %s208_s1 = scalar_lea.vmem %s161_s30, 256  ;;  %p213_p1 = scmp.lt.s32.totalorder %s161_s30, %s161_s30 }
   0x9   :  { %p209_p0 = scmp.ne.s32.totalorder %s161_s30, %s208_s1  ;;  %p214_p2 = scmp.lt.s32.totalorder %s208_s1, %s208_s1 }
   0xb   :  { %p215_p3 = por %p214_p2, %p213_p1 }
   0xd   :  { %p216_p4 = pnand %p215_p3, %p209_p0 }
   0xe   :  { %186 = vmatpush3.bf16.xpose.msra.mxu0 %v103_v18 }
   0xf   :  { %187 = vmatprep.subr.bf16.mxu0 %v232_v5 }
  0x16   :  { %188 = vmatpush3.bf16.xpose.msra.mxu0 %v106_v20 }
  0x17   :  { %189 = vmatprep.subr.bf16.mxu0 %v232_v5 }
  0x1e   :  { %190 = vmatpush3.bf16.xpose.msra.mxu0 %v109_v22 }
  0x90   :  { %v26_v7 = vpop.xlane.xlu0 %25 }
  0x91   :  { %v31_v8 = vmul.f32 0.03125, %v26_v7 }
  0x93   :  { %v33_v9 = vsub.f32 %v19_v0, %v31_v8 }
  0x94   :  { %v29_v10 = vpop.xlane.xlu0 %28 }
  0x95   :  { %v32_v11 = vmul.f32 0.03125, %v29_v10  ;;  %v35_v12 = vmul.f32 %v33_v9, %v33_v9 }
  0x97   :  { %v34_v13 = vsub.f32 %v20_v1, %v32_v11  ;;  %v37_v14 = vsel %vm23_vm0, %v35_v12, 0.0 }
  0x98   :  { %38 = vadd.xlane.f32.xlu1 %v37_v14 }
  0x99   :  { %v36_v15 = vmul.f32 %v34_v13, %v34_v13 }
  0x9b   :  { %v40_v16 = vsel %vm23_vm0, %v36_v15, 0.0 }
  0x9c   :  { %41 = vadd.xlane.f32.xlu1 %v40_v16 }
 0x125   :  { %v39_v23 = vpop.xlane.xlu1 %38 }
 0x126   :  { %v43_v24 = vmul.f32 0.03125, %v39_v23 }
 0x128   :  { %v45_v25 = vadd.f32 1e-05, %v43_v24 }
 0x129   :  { %v42_v26 = vpop.xlane.xlu1 %41 }
 0x12a   :  { %204 = vrsqrt.f32 %v45_v25  ;;  %v44_v27 = vmul.f32 0.03125, %v42_v26 }
 0x12c   :  { %v46_v28 = vadd.f32 1e-05, %v44_v27 }
 0x12e   :  { %206 = vrsqrt.f32 %v46_v28 }
 0x134   :  { %v205_v29 = vpop.eup %204 }
 0x135   :  { %v49_v30 = vmul.f32 %v205_v29, %v33_v9 }
 0x137   :  { %v57_v34 = vmul.f32 %v171_v31, %v49_v30 }
 0x138   :  { %v207_v32 = vpop.eup %206 }
 0x139   :  { %v50_v33 = vmul.f32 %v207_v32, %v34_v13  ;;  %v65_v37 = vadd.f32 %v172_v35, %v57_v34 }
 0x13b   :  { %v58_v36 = vmul.f32 %v171_v31, %v50_v33 }
 0x13d   :  { %v66_v38 = vadd.f32 %v172_v35, %v58_v36 }
 0x13f   :  { %v67_v39 = vpack.c.bf16 %v66_v38, %v65_v37 }
 0x141   :  { %192 = vmatmul.mubr.msk.bf16.vlgmr.msra.gmra.mrb[0].mxu0 %vm23_vm0, %v67_v39 }
 0x214   :  { %v145_v40 = vpop.f32.mrb[0].mxu0 }
 0x215   :  { %153 = vst.msk [vmem:[#allocation2] sm:$0xff] %vm152_vm2, %v145_v40  ;;  %v193_v41 = vpop.f32.mrb[1].mxu0 }
 0x216   :  { %v148_v42 = vpop.f32.mrb[2].mxu0 }
 0x217   :  { %154 = vst.msk [vmem:[#allocation2 + $0x8] sm:$0xff] %vm152_vm2, %v148_v42  ;;  %v194_v43 = vpop.f32.mrb[3].mxu0 }
 0x218   :  { %219 = shalt.err (!%p216_p4)
}
 0x219   :  { %s220_s6 = scalar_lea.hbm %s311_s4, 256 }
 0x21a   :  { %p221_p5 = scmp.ne.s32.totalorder %s311_s4, %s220_s6  ;;  %p224_p6 = scmp.lt.u32.totalorder %s220_s6, %s311_s4 }
 0x21c   :  { %p226_p7 = pnand %p224_p6, %p221_p5 }
 0x21e   :  { %229 = shalt.err (!%p226_p7)
}
 0x21f   :  { %s235_s11 = smov 128   ;;  %s236_s12 = smov 8  }
 0x220   :  { %166 = dma.vmem_to_hbm [thread:$0]  %s161_s30, 256, %s311_s4, [#allocation3], %s235_s11, %s235_s11, %s236_s12  }
 0x221   :  { %230 = dma.done.wait [#allocation3], 256  }
 0x222   :  { %231 = vsyncadd [#allocation3], 4294967040 }
 0x223   :  { %170 = vsyncpa [#allocation3], 1 }

// kernel: gpt_forward.3
= control target key start
LH: loop header
LB: loop body
LE: loop exit
PB: predicated region body
PF: predicated region fallthrough
CT: control target
= control target key end

     0   :  { %vm49_vm0 = vcmask 261120   ;;  %v1805_v15 = vmov 0.0   ;;  %vm1806_vm1 = vmmov 0   ;;  %s1809_s20 = smov 104   ;;  %vm222_vm2 = vcmask 64512   ;;  %s1811_s21 = smov 64   ;;  %s2207_s0 = inlined_call_operand.vmem [shape: f32[2,8,32], index: 0, kind: input, shape index: {}, may-alias: {0,13}]   ;;  %s2208_s3 = inlined_call_operand.vmem [shape: bf16[32,96], index: 3, kind: input, shape index: {}]   ;;  %s2209_s1 = inlined_call_operand.vmem [shape: f32[1,32], index: 1, kind: input, shape index: {}]   ;;  %s2210_s2 = inlined_call_operand.vmem [shape: f32[1,32], index: 2, kind: input, shape index: {}]   ;;  %s2211_s4 = inlined_call_operand.vmem [shape: f32[1,96], index: 4, kind: input, shape index: {}]   ;;  %s2212_s5 = inlined_call_operand.vmem [shape: bf16[32,32], index: 5, kind: input, shape index: {}]   ;;  %s2213_s6 = inlined_call_operand.vmem [shape: f32[1,32], index: 6, kind: input, shape index: {}]   ;;  %s2214_s9 = inlined_call_operand.vmem [shape: bf16[32,128], index: 9, kind: input, shape index: {}]   ;;  %s2215_s7 = inlined_call_operand.vmem [shape: f32[1,32], index: 7, kind: input, shape index: {}]   ;;  %s2216_s8 = inlined_call_operand.vmem [shape: f32[1,32], index: 8, kind: input, shape index: {}]   ;;  %s2217_s11 = inlined_call_operand.vmem [shape: bf16[128,32], index: 11, kind: input, shape index: {}]   ;;  %s2218_s10 = inlined_call_operand.vmem [shape: f32[1,128], index: 10, kind: input, shape index: {}]   ;;  %s2219_s12 = inlined_call_operand.vmem [shape: f32[1,32], index: 12, kind: input, shape index: {}]   ;;  %s2220_s13 = inlined_call_operand.vmem [shape: f32[2,8,32], index: 13, kind: output, shape index: {}, may-alias: {0,13}]  }
   0x1   :  { %v1888_v0 = vld [vmem:[%s2207_s0] sm:$0xff]  ;;  %v1893_v1 = vld [vmem:[%s2207_s0 + $0x8] sm:$0xff]  ;;  %1552 = vmatprep.subr.bf16.mxu0 %v1805_v15  ;;  %1572 = vmatprep.subr.bf16.mxu1 %v1805_v15  ;;  %vm712_vm3 = vcmask 1043456   ;;  %s1812_s22 = smov 8   ;;  %s1813_s27 = smov 16   ;;  %vm1134_vm5 = vcmask 130048  }
   0x2   :  { %v50_v2 = vsel %vm49_vm0, %v1888_v0, 0.0  ;;  %v53_v3 = vsel %vm49_vm0, %v1893_v1, 0.0  ;;  %v1747_v14 = vld [vmem:[%s2208_s3] sm:$0xff]   ;;  %v1748_v16 = vld [vmem:[%s2208_s3 + $0x8] sm:$0xff]   ;;  %1556 = vmatprep.mubr.msk.bf16.mxu0 %vm1806_vm1, %v1805_v15  ;;  %1574 = vmatprep.mubr.msk.bf16.mxu1 %vm1806_vm1, %v1805_v15  ;;  %s1814_s28 = smov 24   ;;  %vm1137_vm6 = vcmask 195584  }
   0x3   :  { %51 = vadd.xlane.f32.xlu0 %v50_v2  ;;  %1553 = vmatpush3.bf16.msra.mxu0 %v1747_v14  ;;  %v1461_v25 = vld [vmem:[%s2209_s1] ss:$0 sm:$0xff]  ;;  %s1807_s1 = smov 112  }
   0x4   :  { %1554 = vmatprep.subr.bf16.mxu0 %v1805_v15  ;;  %v1462_v29 = vld [vmem:[%s2210_s2] ss:$0 sm:$0xff]  ;;  %s1808_s2 = smov 120  }
   0x5   :  { %v1463_v34 = vld [vmem:[%s2211_s4] ss:$0 sm:$0xff]  ;;  %s1810_s4 = smov 96  }
   0x7   :  { %54 = vadd.xlane.f32.xlu0 %v53_v3  ;;  %1555 = vmatpush3.bf16.msra.mxu0 %v1748_v16 }
   0x8   :  { %1560 = vmatprep.subr.bf16.mxu0 %v1805_v15 }
  0x90   :  { %v52_v4 = vpop.xlane.xlu0 %51 }
  0x91   :  { %v57_v5 = vmul.f32 0.03125, %v52_v4 }
  0x93   :  { %v59_v6 = vsub.f32 %v1888_v0, %v57_v5 }
  0x94   :  { %v55_v7 = vpop.xlane.xlu0 %54 }
  0x95   :  { %v58_v8 = vmul.f32 0.03125, %v55_v7  ;;  %v61_v9 = vmul.f32 %v59_v6, %v59_v6 }
  0x97   :  { %v60_v10 = vsub.f32 %v1893_v1, %v58_v8  ;;  %v63_v11 = vsel %vm49_vm0, %v61_v9, 0.0 }
  0x98   :  { %64 = vadd.xlane.f32.xlu1 %v63_v11 }
  0x99   :  { %v62_v12 = vmul.f32 %v60_v10, %v60_v10 }
  0x9b   :  { %v66_v13 = vsel %vm49_vm0, %v62_v12, 0.0 }
  0x9c   :  { %67 = vadd.xlane.f32.xlu1 %v66_v13 }
 0x125   :  { %v65_v17 = vpop.xlane.xlu1 %64 }
 0x126   :  { %v69_v18 = vmul.f32 0.03125, %v65_v17 }
 0x128   :  { %v71_v19 = vadd.f32 1e-05, %v69_v18 }
 0x129   :  { %v68_v20 = vpop.xlane.xlu1 %67 }
 0x12a   :  { %1761 = vrsqrt.f32 %v71_v19  ;;  %v70_v21 = vmul.f32 0.03125, %v68_v20 }
 0x12c   :  { %v72_v22 = vadd.f32 1e-05, %v70_v21 }
 0x12e   :  { %1763 = vrsqrt.f32 %v72_v22 }
 0x134   :  { %v1762_v23 = vpop.eup %1761 }
 0x135   :  { %v75_v24 = vmul.f32 %v1762_v23, %v59_v6 }
 0x137   :  { %v83_v28 = vmul.f32 %v1461_v25, %v75_v24 }
 0x138   :  { %v1764_v26 = vpop.eup %1763 }
 0x139   :  { %v76_v27 = vmul.f32 %v1764_v26, %v60_v10  ;;  %v91_v31 = vadd.f32 %v1462_v29, %v83_v28 }
 0x13b   :  { %v84_v30 = vmul.f32 %v1461_v25, %v76_v27 }
 0x13d   :  { %v92_v32 = vadd.f32 %v1462_v29, %v84_v30 }
 0x13f   :  { %v93_v33 = vpack.c.bf16 %v92_v32, %v91_v31 }
 0x141   :  { %1557 = vmatmul.mubr.msk.bf16.vlgmr.msra.gmra.mrb[0].mxu0 %vm49_vm0, %v93_v33 }
 0x142   :  { %1562 = vmatprep.mubr.msk.bf16.mxu0 %vm1806_vm1, %v1805_v15 }
 0x214   :  { %v154_v35 = vpop.f32.mrb[0].mxu0 }
 0x215   :  { %v1558_v36 = vpop.f32.mrb[1].mxu0  ;;  %v155_v37 = vadd.f32 %v1463_v34, %v154_v35 }
 0x216   :  { %v157_v38 = vpop.f32.mrb[2].mxu0 }
 0x217   :  { %v158_v39 = vadd.f32 %v1463_v34, %v157_v38  ;;  %v1559_v40 = vpop.f32.mrb[3].mxu0  ;;  %v161_v42 = vmul.f32 0.35355338, %v155_v37  ;;  %v211_v46 = vpack.c.bf16 %v155_v37, %v155_v37  ;;  %v612_v38 = vlaneseq }
 0x219   :  { %v1707_v41 = vpack.i.bf16 %v158_v39, %v155_v37  ;;  %v162_v43 = vmul.f32 0.35355338, %v158_v39  ;;  %v212_v45 = vpack.c.bf16 %v158_v39, %v158_v39  ;;  %v183_v2 = vpack.c.bf16 %v161_v42, %v161_v42 }
 0x21a   :  { %v613_v39 = vshrl.u32 %v612_v38, 7  ;;  %v615_v40 = vand.u32 127, %v612_v38 }
 0x21b   :  { %1708 = vrot.lane.b32.xlu1 %v1707_v41, %s1807_s1  ;;  %1703 = vrot.lane.b32.xlu0 %v1707_v41, %s1808_s2  ;;  %v1717_v44 = vpack.i.bf16 %v162_v43, %v161_v42  ;;  %v184_v5 = vpack.c.bf16 %v162_v43, %v162_v43 }
 0x21c   :  { %vm2001_vm4 = vcmp.le.s32.totalorder %v615_v40, %v613_v39 }
 0x21f   :  { %1713 = vrot.lane.b32.xlu1 %v1707_v41, %s1809_s20  ;;  %270 = vrot.lane.b32.xlu0 %v212_v45, %s1810_s4 }
 0x223   :  { %220 = vrot.lane.b32.xlu1 %v211_v46, %s1810_s4 }
 0x28d   :  { %v1709_v47 = vpop.permute.xlu1 %1708  ;;  %v1704_v48 = vpop.permute.xlu0 %1703 }
 0x28e   :  { %v1706_v49 = vunpack.i.h.bf16 %v1704_v48  ;;  %v1705_v50 = vunpack.i.l.bf16 %v1704_v48  ;;  %v1710_v51 = vunpack.i.l.bf16 %v1709_v47  ;;  %v1711_v55 = vunpack.i.h.bf16 %v1709_v47 }
 0x290   :  { %v214_v52 = vpack.c.bf16 %v1706_v49, %v1706_v49  ;;  %v213_v53 = vpack.c.bf16 %v1705_v50, %v1705_v50  ;;  %v1935_v56 = vpack.c.bf16 %v1710_v51, %v1710_v51  ;;  %v1940_v59 = vpack.c.bf16 %v1711_v55, %v1711_v55 }
 0x291   :  { %v1714_v54 = vpop.permute.xlu1 %1713  ;;  %v271_v62 = vpop.permute.xlu0 %270 }
 0x292   :  { %319 = vrot.lane.b32.xlu1 %v213_v53, %s1810_s4  ;;  %368 = vrot.lane.b32.xlu0 %v214_v52, %s1810_s4  ;;  %v1716_v60 = vunpack.i.h.bf16 %v1714_v54  ;;  %v1715_v61 = vunpack.i.l.bf16 %v1714_v54  ;;  %v276_v4 = vsel %vm222_vm2, %v271_v62, 0 }
 0x294   :  { %v1946_v63 = vpack.c.bf16 %v1716_v60, %v1716_v60  ;;  %v1948_v3 = vpack.c.bf16 %v1715_v61, %v1715_v61 }
 0x295   :  { %v221_v57 = vpop.permute.xlu1 %220 }
 0x296   :  { %v227_v58 = vsel %vm222_vm2, %v221_v57, 0  ;;  %417 = vrot.lane.b32.xlu0 %v1935_v56, %s1810_s4  ;;  %1718 = vrot.lane.b32.xlu1 %v1717_v44, %s1808_s2 }
 0x297   :  { %1561 = vmatpush3.bf16.xpose.msra.mxu0 %v227_v58 }
 0x298   :  { %1566 = vmatprep.subr.bf16.mxu0 %v1805_v15 }
 0x29a   :  { %1723 = vrot.lane.b32.xlu0 %v1717_v44, %s1807_s1  ;;  %466 = vrot.lane.b32.xlu1 %v1940_v59, %s1810_s4 }
 0x29e   :  { %1563 = vmatmul.mubr.msk.bf16.vlgmr.msra.gmra.mrb[4].mxu0 %vm222_vm2, %v183_v2  ;;  %564 = vrot.lane.b32.xlu0 %v1946_v63, %s1810_s4 }
 0x29f   :  { %515 = vrot.lane.b32.xlu1 %v1948_v3, %s1810_s4  ;;  %1567 = vmatpush3.bf16.xpose.msra.mxu0 %v276_v4 }
 0x2a0   :  { %1568 = vmatprep.mubr.msk.bf16.mxu0 %vm1806_vm1, %v1805_v15  ;;  %1578 = vmatprep.subr.bf16.mxu0 %v1805_v15 }
 0x2a2   :  { %707 = vrot.lane.b32.xlu0 %v211_v46, %s1811_s21 }
 0x2a3   :  { %1728 = vrot.lane.b32.xlu1 %v1717_v44, %s1809_s20 }
 0x2a6   :  { %1569 = vmatmul.mubr.msk.bf16.vlgmr.msra.gmra.mrb[8].mxu0 %vm222_vm2, %v184_v5 }
 0x2a7   :  { %756 = vrot.lane.b32.xlu1 %v212_v45, %s1811_s21  ;;  %1580 = vmatprep.mubr.msk.bf16.mxu0 %vm1806_vm1, %v1805_v15 }
 0x2ab   :  { %804 = vrot.lane.b32.xlu1 %v213_v53, %s1811_s21 }
 0x2af   :  { %852 = vrot.lane.b32.xlu1 %v214_v52, %s1811_s21 }
 0x304   :  { %v320_v6 = vpop.permute.xlu1 %319  ;;  %v369_v7 = vpop.permute.xlu0 %368 }
 0x305   :  { %v374_v8 = vsel %vm222_vm2, %v369_v7, 0  ;;  %v325_v9 = vsel %vm222_vm2, %v320_v6, 0 }
 0x306   :  { %1573 = vmatpush3.bf16.xpose.msra.mxu1 %v325_v9  ;;  %1579 = vmatpush3.bf16.xpose.msra.mxu0 %v374_v8 }
 0x307   :  { %1584 = vmatprep.subr.bf16.mxu1 %v1805_v15  ;;  %1590 = vmatprep.subr.bf16.mxu0 %v1805_v15 }
 0x308   :  { %v418_v10 = vpop.permute.xlu0 %417  ;;  %v1719_v11 = vpop.permute.xlu1 %1718 }
 0x309   :  { %v1721_v12 = vunpack.i.h.bf16 %v1719_v11  ;;  %v1720_v13 = vunpack.i.l.bf16 %v1719_v11  ;;  %v423_v19 = vsel %vm222_vm2, %v418_v10, 0 }
 0x30b   :  { %v186_v14 = vpack.c.bf16 %v1721_v12, %v1721_v12  ;;  %v185_v16 = vpack.c.bf16 %v1720_v13, %v1720_v13 }
 0x30c   :  { %v1724_v17 = vpop.permute.xlu0 %1723  ;;  %v467_v18 = vpop.permute.xlu1 %466 }
 0x30d   :  { %v472_v20 = vsel %vm222_vm2, %v467_v18, 0  ;;  %1575 = vmatmul.mubr.msk.bf16.vlgmr.msra.gmra.mrb[0].mxu1 %vm222_vm2, %v185_v16  ;;  %1581 = vmatmul.mubr.msk.bf16.vlgmr.msra.gmra.mrb[12].mxu0 %vm222_vm2, %v186_v14  ;;  %v1726_v21 = vunpack.i.h.bf16 %v1724_v17  ;;  %v1725_v22 = vunpack.i.l.bf16 %v1724_v17 }
 0x30e   :  { %1585 = vmatpush3.bf16.xpose.msra.mxu1 %v423_v19  ;;  %1591 = vmatpush3.bf16.xpose.msra.mxu0 %v472_v20 }
 0x30f   :  { %1586 = vmatprep.mubr.msk.bf16.mxu1 %vm1806_vm1, %v1805_v15  ;;  %1592 = vmatprep.mubr.msk.bf16.mxu0 %vm1806_vm1, %v1805_v15  ;;  %v188_v25 = vpack.c.bf16 %v1726_v21, %v1726_v21  ;;  %v187_v26 = vpack.c.bf16 %v1725_v22, %v1725_v22 }
 0x310   :  { %1596 = vmatprep.subr.bf16.mxu1 %v1805_v15  ;;  %1602 = vmatprep.subr.bf16.mxu0 %v1805_v15  ;;  %v565_v24 = vpop.permute.xlu0 %564 }
 0x311   :  { %v516_v23 = vpop.permute.xlu1 %515  ;;  %v570_v27 = vsel %vm222_vm2, %v565_v24, 0 }
 0x312   :  { %v521_v28 = vsel %vm222_vm2, %v516_v23, 0 }
 0x314   :  { %v708_v32 = vpop.permute.xlu0 %707 }
 0x315   :  { %v1729_v29 = vpop.permute.xlu1 %1728  ;;  %1587 = vmatmul.mubr.msk.bf16.vlgmr.msra.gmra.mrb[4].mxu1 %vm222_vm2, %v187_v26  ;;  %1593 = vmatmul.mubr.msk.bf16.vlgmr.msra.gmra.mrb[16].mxu0 %vm222_vm2, %v188_v25  ;;  %v714_v36 = vsel %vm712_vm3, %v708_v32, 0 }
 0x316   :  { %1597 = vmatpush3.bf16.xpose.msra.mxu1 %v521_v28  ;;  %1603 = vmatpush3.bf16.xpose.msra.mxu0 %v570_v27  ;;  %v1731_v30 = vunpack.i.h.bf16 %v1729_v29  ;;  %v1730_v31 = vunpack.i.l.bf16 %v1729_v29 }
 0x317   :  { %1598 = vmatprep.mubr.msk.bf16.mxu1 %vm1806_vm1, %v1805_v15  ;;  %1604 = vmatprep.mubr.msk.bf16.mxu0 %vm1806_vm1, %v1805_v15 }
 0x318   :  { %1608 = vmatprep.subr.bf16.mxu1 %v1805_v15  ;;  %1614 = vmatprep.subr.bf16.mxu0 %v1805_v15  ;;  %v190_v34 = vpack.c.bf16 %v1731_v30, %v1731_v30  ;;  %v189_v35 = vpack.c.bf16 %v1730_v31, %v1730_v31 }
 0x319   :  { %v757_v33 = vpop.permute.xlu1 %756 }
 0x31a   :  { %v762_v37 = vsel %vm712_vm3, %v757_v33, 0 }
 0x31d   :  { %1599 = vmatmul.mubr.msk.bf16.vlgmr.msra.gmra.mrb[8].mxu1 %vm222_vm2, %v189_v35  ;;  %1605 = vmatmul.mubr.msk.bf16.vlgmr.msra.gmra.mrb[20].mxu0 %vm222_vm2, %v190_v34  ;;  %v805_v28 = vpop.permute.xlu1 %804 }
 0x31e   :  { %1609 = vmatpush3.bf16.msra.mxu1 %v714_v36  ;;  %1615 = vmatpush3.bf16.msra.mxu0 %v762_v37 }
 0x31f   :  { %1610 = vmatprep.mubr.msk.bf16.mxu1 %vm1806_vm1, %v1805_v15  ;;  %1620 = vmatprep.subr.bf16.mxu1 %v1805_v15 }
 0x320   :  { %1616 = vmatprep.mubr.msk.bf16.mxu0 %vm1806_vm1, %v1805_v15  ;;  %1626 = vmatprep.subr.bf16.mxu0 %v1805_v15 }
 0x321   :  { %v853_v32 = vpop.permute.xlu1 %852 }
 0x322   :  { %v858_v40 = vsel %vm712_vm3, %v853_v32, 0 }
 0x371   :  { %v263_v42 = vpop.f32.mrb[4].mxu0 }
 0x372   :  { %v619_v43 = vsel %vm2001_vm4, %v263_v42, -1e+30  ;;  %v1564_v44 = vpop.f32.mrb[5].mxu0 }
 0x373   :  { %v266_v45 = vpop.f32.mrb[6].mxu0  ;;  %v627_v46 = vsel %vm222_vm2, %v619_v43, -inf }
 0x374   :  { %628 = vmax.xlane.f32.xlu0 %v627_v46  ;;  %v1565_v47 = vpop.f32.mrb[7].mxu0 }
 0x379   :  { %v312_v48 = vpop.f32.mrb[8].mxu0 }
 0x37a   :  { %v620_v49 = vsel %vm2001_vm4, %v312_v48, -1e+30  ;;  %v1570_v50 = vpop.f32.mrb[9].mxu0 }
 0x37b   :  { %v315_v51 = vpop.f32.mrb[10].mxu0  ;;  %v630_v52 = vsel %vm222_vm2, %v620_v49, -inf }
 0x37c   :  { %631 = vmax.xlane.f32.xlu1 %v630_v52  ;;  %v1571_v53 = vpop.f32.mrb[11].mxu0 }
 0x38d   :  { %948 = vrot.lane.b32.xlu1 %v1940_v59, %s1811_s21 }
 0x3e0   :  { %v361_v54 = vpop.f32.mrb[0].mxu1  ;;  %v410_v55 = vpop.f32.mrb[12].mxu0 }
 0x3e1   :  { %v2015_v57 = vsel %vm2001_vm4, %v361_v54, -1e+30  ;;  %v1576_v58 = vpop.f32.mrb[1].mxu1  ;;  %v1582_v60 = vpop.f32.mrb[13].mxu0  ;;  %v2021_v4 = vsel %vm2001_vm4, %v410_v55, -1e+30 }
 0x3e2   :  { %v364_v61 = vpop.f32.mrb[2].mxu1  ;;  %v413_v62 = vpop.f32.mrb[14].mxu0  ;;  %v633_v2 = vsel %vm222_vm2, %v2015_v57, -inf  ;;  %v636_v6 = vsel %vm222_vm2, %v2021_v4, -inf }
 0x3e3   :  { %v1577_v5 = vpop.f32.mrb[3].mxu1  ;;  %634 = vmax.xlane.f32.xlu0 %v633_v2  ;;  %v1583_v59 = vpop.f32.mrb[15].mxu0 }
 0x3e7   :  { %637 = vmax.xlane.f32.xlu0 %v636_v6 }
 0x3e8   :  { %v459_v7 = vpop.f32.mrb[4].mxu1  ;;  %v508_v8 = vpop.f32.mrb[16].mxu0 }
 0x3e9   :  { %v2027_v9 = vsel %vm2001_vm4, %v508_v8, -1e+30  ;;  %v1588_v10 = vpop.f32.mrb[5].mxu1  ;;  %v1594_v11 = vpop.f32.mrb[17].mxu0  ;;  %v2052_v38 = vsel %vm2001_vm4, %v459_v7, -1e+30 }
 0x3ea   :  { %v462_v12 = vpop.f32.mrb[6].mxu1  ;;  %v511_v13 = vpop.f32.mrb[18].mxu0  ;;  %v642_v14 = vsel %vm222_vm2, %v2027_v9, -inf  ;;  %v639_v42 = vsel %vm222_vm2, %v2052_v38, -inf }
 0x3eb   :  { %v1589_v16 = vpop.f32.mrb[7].mxu1  ;;  %643 = vmax.xlane.f32.xlu1 %v642_v14  ;;  %v1595_v17 = vpop.f32.mrb[19].mxu0 }
 0x3f0   :  { %v557_v18 = vpop.f32.mrb[8].mxu1  ;;  %v606_v19 = vpop.f32.mrb[20].mxu0 }
 0x3f1   :  { %v2033_v20 = vsel %vm2001_vm4, %v606_v19, -1e+30  ;;  %v1600_v21 = vpop.f32.mrb[9].mxu1  ;;  %v1606_v22 = vpop.f32.mrb[21].mxu0 }
 0x3f2   :  { %v560_v23 = vpop.f32.mrb[10].mxu1  ;;  %v609_v24 = vpop.f32.mrb[22].mxu0  ;;  %v648_v25 = vsel %vm222_vm2, %v2033_v20, -inf }
 0x3f3   :  { %v1601_v26 = vpop.f32.mrb[11].mxu1  ;;  %649 = vmax.xlane.f32.xlu1 %v648_v25  ;;  %v1607_v27 = vpop.f32.mrb[23].mxu0 }
 0x3fd   :  { %900 = vrot.lane.b32.xlu0 %v1935_v56, %s1811_s21  ;;  %v810_v56 = vsel %vm712_vm3, %v805_v28, 0 }
 0x401   :  { %v629_v29 = vpop.xlane.xlu0 %628 }
 0x402   :  { %v651_v30 = vsub.f32 %v619_v43, %v629_v29  ;;  %v2060_v43 = vsel %vm2001_vm4, %v557_v18, -1e+30 }
 0x403   :  { %v645_v44 = vsel %vm222_vm2, %v2060_v43, -inf }
 0x404   :  { %v659_v31 = vmul.f32 1.442695, %v651_v30  ;;  %1044 = vrot.lane.b32.xlu1 %v1946_v63, %s1811_s21 }
 0x406   :  { %1765 = vpow2.f32 %v659_v31 }
 0x409   :  { %v632_v33 = vpop.xlane.xlu1 %631 }
 0x40a   :  { %v652_v34 = vsub.f32 %v620_v49, %v632_v33 }
 0x40c   :  { %v661_v35 = vmul.f32 1.442695, %v652_v34 }
 0x40d   :  { %v949_v47 = vpop.permute.xlu1 %948 }
 0x40e   :  { %1767 = vpow2.f32 %v661_v35  ;;  %v954_v59 = vsel %vm712_vm3, %v949_v47, 0 }
 0x410   :  { %v2041_v36 = vpop.eup %1765 }
 0x411   :  { %v699_v37 = vpack.c.bf16 %v2041_v36, %v2041_v36  ;;  %v675_v30 = vsel %vm222_vm2, %v2041_v36, 0.0 }
 0x413   :  { %1611 = vmatmul.mubr.msk.bf16.vlgmr.msra.gmra.mrb[12].mxu1 %vm222_vm2, %v699_v37 }
 0x414   :  { %1621 = vmatpush3.bf16.msra.mxu1 %v810_v56  ;;  %1622 = vmatprep.mubr.msk.bf16.mxu1 %vm1806_vm1, %v1805_v15 }
 0x415   :  { %1632 = vmatprep.subr.bf16.mxu1 %v1805_v15 }
 0x418   :  { %v1768_v63 = vpop.eup %1767 }
 0x419   :  { %v700_v39 = vpack.c.bf16 %v1768_v63, %v1768_v63  ;;  %v678_v12 = vsel %vm222_vm2, %v1768_v63, 0.0 }
 0x41b   :  { %1617 = vmatmul.mubr.msk.bf16.vlgmr.msra.gmra.mrb[24].mxu0 %vm222_vm2, %v700_v39 }
 0x41c   :  { %1627 = vmatpush3.bf16.msra.mxu0 %v858_v40  ;;  %640 = vmax.xlane.f32.xlu0 %v639_v42 }
 0x41d   :  { %1628 = vmatprep.mubr.msk.bf16.mxu0 %vm1806_vm1, %v1805_v15  ;;  %1638 = vmatprep.subr.bf16.mxu0 %v1805_v15 }
 0x420   :  { %646 = vmax.xlane.f32.xlu0 %v645_v44 }
 0x436   :  { %996 = vrot.lane.b32.xlu0 %v1948_v3, %s1811_s21 }
 0x470   :  { %v635_v45 = vpop.xlane.xlu0 %634 }
 0x471   :  { %v653_v46 = vsub.f32 %v2015_v57, %v635_v45 }
 0x473   :  { %v663_v41 = vmul.f32 1.442695, %v653_v46 }
 0x474   :  { %v638_v48 = vpop.xlane.xlu0 %637 }
 0x475   :  { %1769 = vpow2.f32 %v663_v41  ;;  %v654_v49 = vsub.f32 %v2021_v4, %v638_v48 }
 0x477   :  { %v665_v50 = vmul.f32 1.442695, %v654_v49 }
 0x478   :  { %v644_v51 = vpop.xlane.xlu1 %643  ;;  %v901_v55 = vpop.permute.xlu0 %900 }
 0x479   :  { %1771 = vpow2.f32 %v665_v50  ;;  %v656_v52 = vsub.f32 %v2027_v9, %v644_v51  ;;  %v906_v61 = vsel %vm712_vm3, %v901_v55, 0 }
 0x47b   :  { %v669_v53 = vmul.f32 1.442695, %v656_v52 }
 0x47d   :  { %1773 = vpow2.f32 %v669_v53 }
 0x47f   :  { %v1770_v54 = vpop.eup %1769 }
 0x480   :  { %v650_v58 = vpop.xlane.xlu1 %649  ;;  %v681_v3 = vsel %vm222_vm2, %v1770_v54, 0.0  ;;  %v701_v60 = vpack.c.bf16 %v1770_v54, %v1770_v54 }
 0x481   :  { %v658_v57 = vsub.f32 %v2033_v20, %v650_v58  ;;  %682 = vadd.xlane.f32.xlu0 %v681_v3 }
 0x482   :  { %1623 = vmatmul.mubr.msk.bf16.vlgmr.msra.gmra.mrb[16].mxu1 %vm222_vm2, %v701_v60 }
 0x483   :  { %v1772_v62 = vpop.eup %1771  ;;  %v673_v2 = vmul.f32 1.442695, %v658_v57  ;;  %1633 = vmatpush3.bf16.msra.mxu1 %v906_v61  ;;  %1634 = vmatprep.mubr.msk.bf16.mxu1 %vm1806_vm1, %v1805_v15 }
 0x484   :  { %v684_v4 = vsel %vm222_vm2, %v1772_v62, 0.0  ;;  %v702_v5 = vpack.c.bf16 %v1772_v62, %v1772_v62  ;;  %1644 = vmatprep.subr.bf16.mxu1 %v1805_v15  ;;  %v1045_v7 = vpop.permute.xlu1 %1044 }
 0x485   :  { %1775 = vpow2.f32 %v673_v2  ;;  %685 = vadd.xlane.f32.xlu1 %v684_v4  ;;  %v1050_v9 = vsel %vm712_vm3, %v1045_v7, 0 }
 0x486   :  { %1629 = vmatmul.mubr.msk.bf16.vlgmr.msra.gmra.mrb[28].mxu0 %vm222_vm2, %v702_v5  ;;  %v1749_v5 = vld [vmem:[%s2212_s5] sm:$0xff]  }
 0x487   :  { %1639 = vmatpush3.bf16.msra.mxu0 %v954_v59  ;;  %1640 = vmatprep.mubr.msk.bf16.mxu0 %vm1806_vm1, %v1805_v15  ;;  %v1774_v6 = vpop.eup %1773 }
 0x488   :  { %1650 = vmatprep.subr.bf16.mxu0 %v1805_v15  ;;  %v704_v8 = vpack.c.bf16 %v1774_v6, %v1774_v6  ;;  %v690_v26 = vsel %vm222_vm2, %v1774_v6, 0.0 }
 0x48e   :  { %1641 = vmatmul.mubr.msk.bf16.vlgmr.msra.gmra.mrb[32].mxu0 %vm222_vm2, %v704_v8 }
 0x48f   :  { %v1776_v10 = vpop.eup %1775  ;;  %1651 = vmatpush3.bf16.msra.mxu0 %v1050_v9  ;;  %1652 = vmatprep.mubr.msk.bf16.mxu0 %vm1806_vm1, %v1805_v15 }
 0x490   :  { %v696_v11 = vsel %vm222_vm2, %v1776_v10, 0.0  ;;  %1664 = vmatprep.subr.bf16.mxu0 %v1805_v15  ;;  %v706_v13 = vpack.c.bf16 %v1776_v10, %v1776_v10 }
 0x491   :  { %697 = vadd.xlane.f32.xlu1 %v696_v11  ;;  %v1750_v11 = vld [vmem:[%s2212_s5 + $0x8] sm:$0xff]  }
 0x495   :  { %679 = vadd.xlane.f32.xlu1 %v678_v12 }
 0x496   :  { %1653 = vmatmul.mubr.msk.bf16.vlgmr.msra.gmra.mrb[36].mxu0 %vm222_vm2, %v706_v13 }
 0x497   :  { %1668 = vmatprep.mubr.msk.bf16.mxu0 %vm1806_vm1, %v1805_v15 }
 0x4a9   :  { %v641_v14 = vpop.xlane.xlu0 %640 }
 0x4aa   :  { %v655_v16 = vsub.f32 %v2052_v38, %v641_v14 }
 0x4ac   :  { %v667_v17 = vmul.f32 1.442695, %v655_v16 }
 0x4ad   :  { %v647_v18 = vpop.xlane.xlu0 %646 }
 0x4ae   :  { %1777 = vpow2.f32 %v667_v17  ;;  %v657_v19 = vsub.f32 %v2060_v43, %v647_v18 }
 0x4b0   :  { %v671_v20 = vmul.f32 1.442695, %v657_v19 }
 0x4b1   :  { %v997_v22 = vpop.permute.xlu0 %996 }
 0x4b2   :  { %1779 = vpow2.f32 %v671_v20  ;;  %v1002_v25 = vsel %vm712_vm3, %v997_v22, 0 }
 0x4b8   :  { %v1778_v21 = vpop.eup %1777 }
 0x4b9   :  { %v687_v23 = vsel %vm222_vm2, %v1778_v21, 0.0  ;;  %v703_v24 = vpack.c.bf16 %v1778_v21, %v1778_v21 }
 0x4ba   :  { %688 = vadd.xlane.f32.xlu0 %v687_v23 }
 0x4bb   :  { %1635 = vmatmul.mubr.msk.bf16.vlgmr.msra.gmra.mrb[20].mxu1 %vm222_vm2, %v703_v24 }
 0x4bc   :  { %1645 = vmatpush3.bf16.msra.mxu1 %v1002_v25  ;;  %1646 = vmatprep.mubr.msk.bf16.mxu1 %vm1806_vm1, %v1805_v15  ;;  %v1780_v27 = vpop.eup %1779 }
 0x4bd   :  { %1656 = vmatprep.subr.bf16.mxu1 %v1805_v15  ;;  %v693_v28 = vsel %vm222_vm2, %v1780_v27, 0.0  ;;  %v705_v29 = vpack.c.bf16 %v1780_v27, %v1780_v27 }
 0x4be   :  { %691 = vadd.xlane.f32.xlu0 %v690_v26 }
 0x4c2   :  { %694 = vadd.xlane.f32.xlu0 %v693_v28 }
 0x4c3   :  { %1647 = vmatmul.mubr.msk.bf16.vlgmr.msra.gmra.mrb[24].mxu1 %vm222_vm2, %v705_v29 }
 0x4c4   :  { %1660 = vmatprep.mubr.msk.bf16.mxu1 %vm1806_vm1, %v1805_v15  ;;  %1657 = vmatpush3.bf16.msra.mxu1 %v1749_v5  ;;  %v1751_v5 = vld [vmem:[%s2214_s9] sm:$0xff]  }
 0x4c5   :  { %1658 = vmatprep.subr.bf16.mxu1 %v1805_v15  ;;  %1665 = vmatpush3.bf16.msra.mxu0 %v1751_v5 }
 0x4c6   :  { %676 = vadd.xlane.f32.xlu0 %v675_v30  ;;  %1666 = vmatprep.subr.bf16.mxu0 %v1805_v15 }
 0x4c8   :  { %1659 = vmatpush3.bf16.msra.mxu1 %v1750_v11 }
 0x4c9   :  { %1672 = vmatprep.subr.bf16.mxu1 %v1805_v15 }
 0x4e6   :  { %v2110_v31 = vpop.f32.mrb[12].mxu1 }
 0x4e7   :  { %v1612_v32 = vpop.f32.mrb[13].mxu1 }
 0x4e8   :  { %v753_v33 = vpop.f32.mrb[14].mxu1 }
 0x4e9   :  { %v1613_v34 = vpop.f32.mrb[15].mxu1 }
 0x4ee   :  { %v2112_v35 = vpop.f32.mrb[24].mxu0 }
 0x4ef   :  { %v1618_v37 = vpop.f32.mrb[25].mxu0 }
 0x4f0   :  { %v801_v56 = vpop.f32.mrb[26].mxu0 }
 0x4f1   :  { %v1619_v63 = vpop.f32.mrb[27].mxu0 }
 0x50e   :  { %v683_v38 = vpop.xlane.xlu0 %682 }
 0x50f   :  { %1781 = vrcp.f32 %v683_v38 }
 0x512   :  { %v686_v39 = vpop.xlane.xlu1 %685 }
 0x513   :  { %1783 = vrcp.f32 %v686_v39 }
 0x519   :  { %v1782_v44 = vpop.eup %1781 }
 0x51d   :  { %v1784_v45 = vpop.eup %1783 }
 0x51e   :  { %v698_v2 = vpop.xlane.xlu1 %697 }
 0x522   :  { %v680_v25 = vpop.xlane.xlu1 %679 }
 0x547   :  { %v689_v61 = vpop.xlane.xlu0 %688 }
 0x548   :  { %1785 = vrcp.f32 %v689_v61 }
 0x54b   :  { %v692_v62 = vpop.xlane.xlu0 %691 }
 0x54c   :  { %1787 = vrcp.f32 %v692_v62 }
 0x54d   :  { %1789 = vrcp.f32 %v698_v2 }
 0x54f   :  { %v695_v4 = vpop.xlane.xlu0 %694 }
 0x550   :  { %1791 = vrcp.f32 %v695_v4 }
 0x551   :  { %1793 = vrcp.f32 %v680_v25  ;;  %v1754_v25 = vld [vmem:[%s2217_s11 + $0x8] sm:$0xff]  }
 0x552   :  { %v1786_v59 = vpop.eup %1785 }
 0x553   :  { %v677_v26 = vpop.xlane.xlu0 %676 }
 0x554   :  { %1795 = vrcp.f32 %v677_v26  ;;  %v1755_v26 = vld [vmem:[%s2217_s11 + $0x10] sm:$0xff]  }
 0x555   :  { %v846_v40 = vpop.f32.mrb[16].mxu1 }
 0x556   :  { %v1624_v42 = vpop.f32.mrb[17].mxu1  ;;  %v1102_v41 = vmul.f32 %v1782_v44, %v846_v40  ;;  %v1788_v6 = vpop.eup %1787 }
 0x557   :  { %v849_v43 = vpop.f32.mrb[18].mxu1  ;;  %v1790_v16 = vpop.eup %1789 }
 0x558   :  { %v1625_v36 = vpop.f32.mrb[19].mxu1 }
 0x559   :  { %v894_v46 = vpop.f32.mrb[28].mxu0 }
 0x55a   :  { %v1103_v47 = vmul.f32 %v1784_v45, %v894_v46  ;;  %v1630_v48 = vpop.f32.mrb[29].mxu0  ;;  %v1792_v17 = vpop.eup %1791 }
 0x55b   :  { %v897_v49 = vpop.f32.mrb[30].mxu0  ;;  %v1794_v28 = vpop.eup %1793 }
 0x55c   :  { %v1732_v50 = vpack.i.bf16 %v1103_v47, %v1102_v41  ;;  %v1631_v51 = vpop.f32.mrb[31].mxu0  ;;  %v1101_v63 = vmul.f32 %v1794_v28, %v2112_v35  ;;  %v1757_v28 = vld [vmem:[%s2217_s11 + $0x20] sm:$0xff]  }
 0x55e   :  { %1733 = vrot.lane.b32.xlu0 %v1732_v50, %s1812_s22  ;;  %v1796_v30 = vpop.eup %1795 }
 0x55f   :  { %v1100_v56 = vmul.f32 %v1796_v30, %v2110_v31  ;;  %v1483_v31 = vld [vmem:[%s2213_s6] ss:$0 sm:$0xff]  ;;  %v1759_v30 = vld [vmem:[%s2217_s11 + $0x30] sm:$0xff]  }
 0x561   :  { %v990_v52 = vpop.f32.mrb[32].mxu0 }
 0x562   :  { %v1642_v53 = vpop.f32.mrb[33].mxu0  ;;  %v1105_v8 = vmul.f32 %v1788_v6, %v990_v52 }
 0x563   :  { %v993_v54 = vpop.f32.mrb[34].mxu0 }
 0x564   :  { %v1643_v55 = vpop.f32.mrb[35].mxu0 }
 0x569   :  { %v1086_v58 = vpop.f32.mrb[36].mxu0 }
 0x56a   :  { %v1654_v3 = vpop.f32.mrb[37].mxu0  ;;  %v1107_v19 = vmul.f32 %v1790_v16, %v1086_v58 }
 0x56b   :  { %v1089_v60 = vpop.f32.mrb[38].mxu0 }
 0x56c   :  { %v1655_v57 = vpop.f32.mrb[39].mxu0 }
 0x58e   :  { %v942_v7 = vpop.f32.mrb[20].mxu1 }
 0x58f   :  { %v1104_v9 = vmul.f32 %v1786_v59, %v942_v7  ;;  %v1636_v10 = vpop.f32.mrb[21].mxu1  ;;  %v1752_v59 = vld [vmem:[%s2214_s9 + $0x8] sm:$0xff]  }
 0x590   :  { %v945_v12 = vpop.f32.mrb[22].mxu1  ;;  %1667 = vmatpush3.bf16.msra.mxu0 %v1752_v59 }
 0x591   :  { %v1737_v13 = vpack.i.bf16 %v1105_v8, %v1104_v9  ;;  %v1637_v14 = vpop.f32.mrb[23].mxu1 }
 0x592   :  { %v1487_v14 = vld [vmem:[%s2215_s7] ss:$0 sm:$0xff] }
 0x593   :  { %1738 = vrot.lane.b32.xlu1 %v1737_v13, %s1813_s27 }
 0x596   :  { %v1038_v18 = vpop.f32.mrb[24].mxu1 }
 0x597   :  { %v1106_v20 = vmul.f32 %v1792_v17, %v1038_v18  ;;  %v1648_v21 = vpop.f32.mrb[25].mxu1 }
 0x598   :  { %v1041_v22 = vpop.f32.mrb[26].mxu1 }
 0x599   :  { %v1742_v23 = vpack.i.bf16 %v1107_v19, %v1106_v20  ;;  %v1649_v24 = vpop.f32.mrb[27].mxu1  ;;  %v1488_v19 = vld [vmem:[%s2216_s8] ss:$0 sm:$0xff] }
 0x59a   :  { %v1753_v24 = vld [vmem:[%s2217_s11] sm:$0xff]  }
 0x59b   :  { %1743 = vrot.lane.b32.xlu1 %v1742_v23, %s1814_s28 }
 0x5d0   :  { %v1734_v27 = vpop.permute.xlu0 %1733 }
 0x5d1   :  { %v1736_v32 = vunpack.i.h.bf16 %v1734_v27  ;;  %v1735_v33 = vunpack.i.l.bf16 %v1734_v27  ;;  %v1756_v27 = vld [vmem:[%s2217_s11 + $0x18] sm:$0xff]  }
 0x5d3   :  { %v1133_v39 = vsel %vm222_vm2, %v1101_v63, %v1736_v32  ;;  %v1132_v40 = vsel %vm222_vm2, %v1100_v56, %v1735_v33  ;;  %v1760_v32 = vld [vmem:[%s2217_s11 + $0x38] sm:$0xff]   ;;  %v1489_v33 = vld [vmem:[%s2218_s10] ss:$0 sm:$0xff] }
 0x605   :  { %v1739_v29 = vpop.permute.xlu1 %1738 }
 0x606   :  { %v1741_v34 = vunpack.i.h.bf16 %v1739_v29  ;;  %v1740_v37 = vunpack.i.l.bf16 %v1739_v29  ;;  %v1758_v29 = vld [vmem:[%s2217_s11 + $0x28] sm:$0xff]  }
 0x608   :  { %v1136_v44 = vsel %vm1134_vm5, %v1133_v39, %v1741_v34  ;;  %v1135_v36 = vsel %vm1134_vm5, %v1132_v40, %v1740_v37 }
 0x60d   :  { %v1744_v38 = vpop.permute.xlu1 %1743 }
 0x60e   :  { %v1746_v42 = vunpack.i.h.bf16 %v1744_v38  ;;  %v1745_v43 = vunpack.i.l.bf16 %v1744_v38 }
 0x610   :  { %v1139_v45 = vsel %vm1137_vm6, %v1136_v44, %v1746_v42  ;;  %v1138_v46 = vsel %vm1137_vm6, %v1135_v36, %v1745_v43 }
 0x611   :  { %v1140_v41 = vpack.c.bf16 %v1139_v45, %v1138_v46 }
 0x613   :  { %1661 = vmatmul.mubr.msk.bf16.vlgmr.msra.gmra.mrb[28].mxu1 %vm49_vm0, %v1140_v41 }
 0x614   :  { %1688 = vmatprep.mubr.msk.bf16.mxu1 %vm1806_vm1, %v1805_v15  ;;  %1673 = vmatpush3.bf16.msra.mxu1 %v1753_v24 }
 0x615   :  { %1674 = vmatprep.subr.bf16.mxu1 %v1805_v15 }
 0x618   :  { %1675 = vmatpush3.bf16.msra.mxu1 %v1754_v25 }
 0x619   :  { %1676 = vmatprep.subr.bf16.mxu1 %v1805_v15 }
 0x61c   :  { %1677 = vmatpush3.bf16.msra.mxu1 %v1755_v26 }
 0x61d   :  { %1678 = vmatprep.subr.bf16.mxu1 %v1805_v15 }
 0x620   :  { %1679 = vmatpush3.bf16.msra.mxu1 %v1756_v27 }
 0x621   :  { %1680 = vmatprep.subr.bf16.mxu1 %v1805_v15 }
 0x624   :  { %1681 = vmatpush3.bf16.msra.mxu1 %v1757_v28 }
 0x625   :  { %1682 = vmatprep.subr.bf16.mxu1 %v1805_v15 }
 0x628   :  { %1683 = vmatpush3.bf16.msra.mxu1 %v1758_v29 }
 0x629   :  { %1684 = vmatprep.subr.bf16.mxu1 %v1805_v15 }
 0x62c   :  { %1685 = vmatpush3.bf16.msra.mxu1 %v1759_v30 }
 0x62d   :  { %1686 = vmatprep.subr.bf16.mxu1 %v1805_v15 }
 0x630   :  { %1687 = vmatpush3.bf16.msra.mxu1 %v1760_v32 }
 0x6e6   :  { %v1201_v35 = vpop.f32.mrb[28].mxu1 }
 0x6e7   :  { %v1202_v47 = vadd.f32 %v1483_v31, %v1201_v35  ;;  %v1662_v48 = vpop.f32.mrb[29].mxu1 }
 0x6e8   :  { %v1204_v49 = vpop.f32.mrb[30].mxu1 }
 0x6e9   :  { %v2133_v50 = vadd.f32 %v1202_v47, %v1888_v0  ;;  %v1205_v51 = vadd.f32 %v1483_v31, %v1204_v49  ;;  %v1663_v52 = vpop.f32.mrb[31].mxu1 }
 0x6eb   :  { %v2136_v53 = vadd.f32 %v1205_v51, %v1893_v1  ;;  %v1212_v54 = vsel %vm49_vm0, %v2133_v50, 0.0 }
 0x6ec   :  { %1213 = vadd.xlane.f32.xlu1 %v1212_v54 }
 0x6ed   :  { %v1215_v55 = vsel %vm49_vm0, %v2136_v53, 0.0 }
 0x6ee   :  { %1216 = vadd.xlane.f32.xlu0 %v1215_v55 }
 0x779   :  { %v1214_v58 = vpop.xlane.xlu1 %1213 }
 0x77a   :  { %v1218_v3 = vmul.f32 0.03125, %v1214_v58 }
 0x77b   :  { %v1217_v60 = vpop.xlane.xlu0 %1216 }
 0x77c   :  { %v1220_v57 = vsub.f32 %v2133_v50, %v1218_v3  ;;  %v1219_v0 = vmul.f32 0.03125, %v1217_v60  ;;  %v1493_v3 = vld [vmem:[%s2219_s12] ss:$0 sm:$0xff] }
 0x77e   :  { %v1221_v61 = vsub.f32 %v2136_v53, %v1219_v0  ;;  %v1222_v62 = vmul.f32 %v1220_v57, %v1220_v57 }
 0x780   :  { %v1224_v1 = vsel %vm49_vm0, %v1222_v62, 0.0  ;;  %v1223_v2 = vmul.f32 %v1221_v61, %v1221_v61 }
 0x781   :  { %1225 = vadd.xlane.f32.xlu0 %v1224_v1 }
 0x782   :  { %v1227_v4 = vsel %vm49_vm0, %v1223_v2, 0.0 }
 0x785   :  { %1228 = vadd.xlane.f32.xlu0 %v1227_v4 }
 0x80e   :  { %v1226_v6 = vpop.xlane.xlu0 %1225 }
 0x80f   :  { %v1230_v7 = vmul.f32 0.03125, %v1226_v6 }
 0x811   :  { %v1232_v8 = vadd.f32 1e-05, %v1230_v7 }
 0x812   :  { %v1229_v9 = vpop.xlane.xlu0 %1228 }
 0x813   :  { %1797 = vrsqrt.f32 %v1232_v8  ;;  %v1231_v10 = vmul.f32 0.03125, %v1229_v9 }
 0x815   :  { %v1233_v11 = vadd.f32 1e-05, %v1231_v10 }
 0x817   :  { %1799 = vrsqrt.f32 %v1233_v11 }
 0x81d   :  { %v1798_v12 = vpop.eup %1797 }
 0x81e   :  { %v1236_v13 = vmul.f32 %v1798_v12, %v1220_v57 }
 0x820   :  { %v1244_v17 = vmul.f32 %v1487_v14, %v1236_v13 }
 0x821   :  { %v1800_v16 = vpop.eup %1799 }
 0x822   :  { %v1237_v18 = vmul.f32 %v1800_v16, %v1221_v61  ;;  %v1252_v21 = vadd.f32 %v1488_v19, %v1244_v17 }
 0x824   :  { %v1245_v20 = vmul.f32 %v1487_v14, %v1237_v18 }
 0x826   :  { %v1253_v22 = vadd.f32 %v1488_v19, %v1245_v20 }
 0x828   :  { %v1254_v23 = vpack.c.bf16 %v1253_v22, %v1252_v21 }
 0x82a   :  { %1669 = vmatmul.mubr.msk.bf16.vlgmr.msra.gmra.mrb[40].mxu0 %vm49_vm0, %v1254_v23 }
 0x8fd   :  { %v1315_v34 = vpop.f32.mrb[40].mxu0 }
 0x8fe   :  { %v1316_v37 = vadd.f32 %v1489_v33, %v1315_v34  ;;  %v1670_v56 = vpop.f32.mrb[41].mxu0 }
 0x8ff   :  { %v1318_v63 = vpop.f32.mrb[42].mxu0 }
 0x900   :  { %v1324_v38 = vmul.f32 0.044715, %v1316_v37  ;;  %v1319_v39 = vadd.f32 %v1489_v33, %v1318_v63  ;;  %v1671_v40 = vpop.f32.mrb[43].mxu0  ;;  %v1322_v49 = vmul.f32 0.5, %v1316_v37 }
 0x902   :  { %v1326_v42 = vmul.f32 %v1324_v38, %v1316_v37  ;;  %v1325_v43 = vmul.f32 0.044715, %v1319_v39  ;;  %v1323_v51 = vmul.f32 0.5, %v1319_v39 }
 0x904   :  { %v1328_v44 = vmul.f32 %v1326_v42, %v1316_v37  ;;  %v1327_v36 = vmul.f32 %v1325_v43, %v1319_v39 }
 0x906   :  { %v1330_v45 = vadd.f32 %v1328_v44, %v1316_v37  ;;  %v1329_v46 = vmul.f32 %v1327_v36, %v1319_v39 }
 0x908   :  { %v1332_v41 = vmul.f32 0.7978846, %v1330_v45  ;;  %v1331_v15 = vadd.f32 %v1329_v46, %v1319_v39 }
 0x90a   :  { %1801 = vtanh.f32 %v1332_v41  ;;  %v1333_v31 = vmul.f32 0.7978846, %v1331_v15 }
 0x90c   :  { %1803 = vtanh.f32 %v1333_v31 }
 0x914   :  { %v1802_v35 = vpop.eup %1801 }
 0x915   :  { %v1336_v47 = vadd.f32 1.0, %v1802_v35 }
 0x916   :  { %v1804_v48 = vpop.eup %1803 }
 0x917   :  { %v1337_v52 = vadd.f32 1.0, %v1804_v48  ;;  %v1338_v54 = vmul.f32 %v1336_v47, %v1322_v49 }
 0x919   :  { %v1339_v55 = vmul.f32 %v1337_v52, %v1323_v51 }
 0x91b   :  { %v1340_v58 = vpack.c.bf16 %v1339_v55, %v1338_v54 }
 0x91d   :  { %1689 = vmatmul.mubr.bf16.vlgmr.msra.gmra.mrb[32].mxu1 %v1340_v58 }
 0x9f0   :  { %v1446_v60 = vpop.f32.mrb[32].mxu1 }
 0x9f1   :  { %v1447_v57 = vadd.f32 %v1493_v3, %v1446_v60  ;;  %v1690_v0 = vpop.f32.mrb[33].mxu1 }
 0x9f2   :  { %v1449_v61 = vpop.f32.mrb[34].mxu1 }
 0x9f3   :  { %v1453_v62 = vadd.f32 %v1447_v57, %v2133_v50  ;;  %v1450_v1 = vadd.f32 %v1493_v3, %v1449_v61  ;;  %v1691_v2 = vpop.f32.mrb[35].mxu1 }
 0x9f5   :  { %1455 = vst.msk [vmem:[%s2220_s13] sm:$0xff] %vm49_vm0, %v1453_v62  ;;  %v1454_v4 = vadd.f32 %v1450_v1, %v2136_v53 }
 0x9f7   :  { %1456 = vst.msk [vmem:[%s2220_s13 + $0x8] sm:$0xff] %vm49_vm0, %v1454_v4 }

</bundles_post_ra>
